<compile_context>
chip_gen: v5e
topology: v5e:2x2
jax: 0.10.0
libtpu: 0.0.40
codegen_flags: <defaults>
</compile_context>

<pallas_src>
import functools

import jax
import jax.numpy as jnp
from jax.experimental import pallas as pl
from jax.experimental.pallas import tpu as pltpu


# ----------------------------- Pallas kernel -------------------------------

def fused_fcblock_kernel(x_ref, w1_ref, s1_ref, w2_ref, s2_ref,
                         fcw_ref, fcb_ref, o_ref, *, block_num):
    """Whole FCBlock on one (Cp, tl) channels-first tile, resident in VMEM.

    For each block b (static unrolled loop; block_num is small):
        y = leaky_relu_0.2(W1[b] @ x + s1[b])   # conv1 + bn1 folded
        y = leaky_relu_0.2(W2[b] @ y + s2[b])   # conv2 + bn2 folded
        x = x + y                               # residual (dropout == identity)
    out = W_fc2 @ x + b_fc2                     # final 1x1 conv
    """
    x = x_ref[0]                                     # (Cp, tl)
    for b in range(block_num):
        y = jnp.dot(w1_ref[b], x, preferred_element_type=jnp.float32) + s1_ref[b]
        y = jnp.where(y > 0, y, 0.2 * y)
        y = jnp.dot(w2_ref[b], y, preferred_element_type=jnp.float32) + s2_ref[b]
        y = jnp.where(y > 0, y, 0.2 * y)
        x = x + y
    o_ref[0] = (
        jnp.dot(fcw_ref[...], x, preferred_element_type=jnp.float32) + fcb_ref[...]
    )


# ----------------------------- helpers --------------------------------------

def _round_up(x, m):
    return ((x + m - 1) // m) * m


def _fold_conv_bn(w, b, gamma, beta, mean, var, eps=1e-5):
    """Fold Conv1d(k=1) weight/bias with eval-mode BatchNorm1d into one affine.

    Conv (channels-first): v = W @ x + b ; BN: (v - mean) * gamma/sqrt(var+eps) + beta
      ->  (W * scale[:, None]) @ x + ((b - mean) * scale + beta)
    Returns (W_eff: (C_out, C_in), shift: (C_out, 1)).
    """
    scale = gamma / jnp.sqrt(var + eps)
    w_eff = w * scale[:, None]
    shift = ((b - mean) * scale + beta).reshape(-1, 1)
    return w_eff.astype(jnp.float32), shift.astype(jnp.float32)


def _vmem_limit_bytes(tl, cp, cop, block_num):
    # resident (possibly double-buffered) weights + 2-deep in/out tiles + temps
    weight_bytes = 2 * 4 * (2 * block_num * cp * cp + 2 * block_num * cp
                            + cp * cop + cop)
    act_bytes = 4 * 2 * (tl * cp + tl * cop)
    temp_bytes = 4 * 4 * tl * cp
    est = weight_bytes + act_bytes + temp_bytes + (4 << 20)
    return int(min(max(est, 32 << 20), 64 << 20))


# ----------------------------- parameters -----------------------------------

def init_fcblock_params(key, channel_out, linear_size, block_num):
    """Deterministic synthetic RAW parameters (conv weights + BN statistics)."""
    C = linear_size
    blocks = []
    for _ in range(block_num):
        keys = jax.random.split(key, 13)
        key = keys[0]
        blk = {}
        for j, name in enumerate(("1", "2")):
            base = 1 + 6 * j
            blk["w" + name] = 0.1 * jax.random.normal(keys[base + 0], (C, C), jnp.float32)
            blk["b" + name] = 0.1 * jax.random.normal(keys[base + 1], (C,), jnp.float32)
            blk["gamma" + name] = 1.0 + 0.1 * jax.random.normal(keys[base + 2], (C,), jnp.float32)
            blk["beta" + name] = 0.1 * jax.random.normal(keys[base + 3], (C,), jnp.float32)
            blk["mean" + name] = 0.1 * jax.random.normal(keys[base + 4], (C,), jnp.float32)
            blk["var" + name] = jnp.abs(jax.random.normal(keys[base + 5], (C,), jnp.float32)) + 0.5
        blocks.append(blk)
    k1, k2 = jax.random.split(key)
    fc2_w = 0.1 * jax.random.normal(k1, (channel_out, C), jnp.float32)   # (C_out, C_in)
    fc2_b = 0.1 * jax.random.normal(k2, (channel_out,), jnp.float32)
    return {"blocks": blocks, "fc2_w": fc2_w, "fc2_b": fc2_b}


def pack_fcblock_params(params, eps=1e-5):
    """Fold conv+BN per block, stack across blocks, zero-pad channel dims to 128."""
    C_out, C = params["fc2_w"].shape
    Cp = max(128, _round_up(C, 128))
    Cop = max(128, _round_up(C_out, 128))

    def pad2(a, r, c):
        return jnp.pad(a, ((0, r - a.shape[0]), (0, c - a.shape[1])))

    w1s, s1s, w2s, s2s = [], [], [], []
    for blk in params["blocks"]:
        for name, (wl, sl) in (("1", (w1s, s1s)), ("2", (w2s, s2s))):
            w_eff, shift = _fold_conv_bn(
                blk["w" + name], blk["b" + name], blk["gamma" + name],
                blk["beta" + name], blk["mean" + name], blk["var" + name], eps)
            wl.append(pad2(w_eff, Cp, Cp))
            sl.append(pad2(shift, Cp, 1))

    return {
        "w1": jnp.stack(w1s),                                   # (B, Cp, Cp)
        "s1": jnp.stack(s1s),                                   # (B, Cp, 1)
        "w2": jnp.stack(w2s),                                   # (B, Cp, Cp)
        "s2": jnp.stack(s2s),                                   # (B, Cp, 1)
        "fcw": pad2(params["fc2_w"].astype(jnp.float32), Cop, Cp),          # (Cop, Cp)
        "fcb": pad2(params["fc2_b"].reshape(-1, 1).astype(jnp.float32), Cop, 1),  # (Cop, 1)
    }


# ----------------------------- forward --------------------------------------

@functools.partial(jax.jit, static_argnames=("c_out", "tl"))
def fcblock_forward(x_ncl, packed, *, c_out, tl=512):
    """x_ncl: (N, C=linear_size, L) f32 -> (N, c_out, L) f32."""
    N, C, L = x_ncl.shape
    block_num, Cp, _ = packed["w1"].shape
    Cop = packed["fcw"].shape[0]

    # Lane-dense L tiling (multiples of 128); channel dims zero-padded to Cp/Cop.
    tl_eff = min(max(128, (tl // 128) * 128), max(128, _round_up(L, 128)))
    Lp = _round_up(L, tl_eff)
    x_pad = jnp.pad(x_ncl, ((0, 0), (0, Cp - C), (0, Lp - L)))

    grid = (N, Lp // tl_eff)
    kernel = functools.partial(fused_fcblock_kernel, block_num=block_num)

    y = pl.pallas_call(
        kernel,
        out_shape=jax.ShapeDtypeStruct((N, Cop, Lp), jnp.float32),
        grid_spec=pltpu.PrefetchScalarGridSpec(
            num_scalar_prefetch=0,
            grid=grid,
            in_specs=[
                pl.BlockSpec((1, Cp, tl_eff), lambda n, l: (n, 0, l)),
                pl.BlockSpec((block_num, Cp, Cp), lambda n, l: (0, 0, 0)),
                pl.BlockSpec((block_num, Cp, 1), lambda n, l: (0, 0, 0)),
                pl.BlockSpec((block_num, Cp, Cp), lambda n, l: (0, 0, 0)),
                pl.BlockSpec((block_num, Cp, 1), lambda n, l: (0, 0, 0)),
                pl.BlockSpec((Cop, Cp), lambda n, l: (0, 0)),
                pl.BlockSpec((Cop, 1), lambda n, l: (0, 0)),
            ],
            out_specs=pl.BlockSpec((1, Cop, tl_eff), lambda n, l: (n, 0, l)),
        ),
        compiler_params=pltpu.CompilerParams(
            dimension_semantics=("parallel", "parallel"),
            vmem_limit_bytes=_vmem_limit_bytes(tl_eff, Cp, Cop, block_num),
        ),
    )(x_pad, packed["w1"], packed["s1"], packed["w2"], packed["s2"],
      packed["fcw"], packed["fcb"])

    return y[:, :c_out, :L]


# ----------------------------- reference -------------------------------------

def fcblock_reference(x_ncl, params, eps=1e-5):
    """Pure-JAX reference from RAW parameters: Conv1d(k=1) + eval-BN + LeakyReLU."""
    def conv(w, b, x):                  # w: (Cout, Cin), x: (N, Cin, L)
        return jnp.einsum("oc,ncl->nol", w, x) + b[None, :, None]

    def bn(g, be, m, v, x):
        scale = g / jnp.sqrt(v + eps)
        return (x - m[None, :, None]) * scale[None, :, None] + be[None, :, None]

    def lrelu(v):
        return jnp.where(v > 0, v, 0.2 * v)

    x = x_ncl
    for blk in params["blocks"]:
        y = lrelu(bn(blk["gamma1"], blk["beta1"], blk["mean1"], blk["var1"],
                     conv(blk["w1"], blk["b1"], x)))
        y = lrelu(bn(blk["gamma2"], blk["beta2"], blk["mean2"], blk["var2"],
                     conv(blk["w2"], blk["b2"], y)))
        x = x + y                       # dropout == identity at inference
    return conv(params["fc2_w"], params["fc2_b"], x)


if __name__ == "__main__":
    # Small shapes consistent with the module: x is (N, linear_size, L) NCL.
    N, L = 2, 16
    linear_size = 32
    channel_out = 16
    block_num = 2

    key = jax.random.PRNGKey(0)
    k_x, k_p = jax.random.split(key)
    x = jax.random.normal(k_x, (N, linear_size, L), jnp.float32)
    params = init_fcblock_params(k_p, channel_out, linear_size, block_num)
    packed = pack_fcblock_params(params)

    out = fcblock_forward(x, packed, c_out=channel_out, tl=512)
    out = jax.block_until_ready(out)

    ref = fcblock_reference(x, params)
    assert out.shape == (N, channel_out, L), out.shape
    assert jnp.allclose(out, ref, rtol=1e-4, atol=1e-4), "mismatch vs reference"

    print("KERNEL_OK")
</pallas_src>

<mosaic_0001>
module attributes {stable_mosaic.version = 11 : i64} {
  func.func @fused_fcblock_kernel(%arg0: i32, %arg1: i32, %arg2: memref<1x128x128xf32, #tpu.memory_space<vmem>>, %arg3: memref<2x128x128xf32, #tpu.memory_space<vmem>>, %arg4: memref<2x128x1xf32, #tpu.memory_space<vmem>>, %arg5: memref<2x128x128xf32, #tpu.memory_space<vmem>>, %arg6: memref<2x128x1xf32, #tpu.memory_space<vmem>>, %arg7: memref<128x128xf32, #tpu.memory_space<vmem>>, %arg8: memref<128x1xf32, #tpu.memory_space<vmem>>, %arg9: memref<1x128x128xf32, #tpu.memory_space<vmem>>) attributes {dimension_semantics = [#tpu.dimension_semantics<parallel>, #tpu.dimension_semantics<parallel>], iteration_bounds = array<i64: 2, 1>, scalar_prefetch = 0 : i64, scratch_operands = 0 : i64, tpu.core_type = #tpu.core_type<tc>, window_params = [{transform_indices = @transform_0, window_bounds = array<i64: 1, 128, 128>}, {pipeline_mode = #tpu.pipeline_mode<synchronous>, transform_indices = @transform_1, window_bounds = array<i64: 2, 128, 128>}, {pipeline_mode = #tpu.pipeline_mode<synchronous>, transform_indices = @transform_2, window_bounds = array<i64: 2, 128, 1>}, {pipeline_mode = #tpu.pipeline_mode<synchronous>, transform_indices = @transform_3, window_bounds = array<i64: 2, 128, 128>}, {pipeline_mode = #tpu.pipeline_mode<synchronous>, transform_indices = @transform_4, window_bounds = array<i64: 2, 128, 1>}, {pipeline_mode = #tpu.pipeline_mode<synchronous>, transform_indices = @transform_5, window_bounds = array<i64: 128, 128>}, {pipeline_mode = #tpu.pipeline_mode<synchronous>, transform_indices = @transform_6, window_bounds = array<i64: 128, 1>}, {transform_indices = @transform_7, window_bounds = array<i64: 1, 128, 128>}]} {
    %c0 = arith.constant 0 : index
    %c0_0 = arith.constant 0 : index
    %c0_1 = arith.constant 0 : index
    %0 = vector.load %arg2[%c0, %c0_0, %c0_1] : memref<1x128x128xf32, #tpu.memory_space<vmem>>, vector<1x128x128xf32>
    %1 = vector.shape_cast %0 : vector<1x128x128xf32> to vector<128x128xf32>
    %c0_2 = arith.constant 0 : index
    %c0_3 = arith.constant 0 : index
    %c0_4 = arith.constant 0 : index
    %2 = vector.load %arg3[%c0_2, %c0_3, %c0_4] : memref<2x128x128xf32, #tpu.memory_space<vmem>>, vector<1x128x128xf32>
    %3 = vector.shape_cast %2 : vector<1x128x128xf32> to vector<128x128xf32>
    %cst = arith.constant dense<0.000000e+00> : vector<128x128xf32>
    %4 = tpu.matmul %3, %1, %cst {dimension_numbers = #tpu.dot_dimension_numbers<[1], [0], [0], [1], [0, 0, 1, 1], [], []>} : vector<128x128xf32>, vector<128x128xf32>, vector<128x128xf32> -> vector<128x128xf32>
    %c0_5 = arith.constant 0 : index
    %c0_6 = arith.constant 0 : index
    %c0_7 = arith.constant 0 : index
    %5 = vector.load %arg4[%c0_5, %c0_6, %c0_7] : memref<2x128x1xf32, #tpu.memory_space<vmem>>, vector<1x128x1xf32>
    %6 = vector.shape_cast %5 : vector<1x128x1xf32> to vector<128x1xf32>
    %7 = vector.broadcast %6 : vector<128x1xf32> to vector<128x128xf32>
    %8 = arith.addf %4, %7 : vector<128x128xf32>
    %cst_8 = arith.constant 0.000000e+00 : f32
    %9 = vector.broadcast %cst_8 : f32 to vector<128x128xf32>
    %10 = arith.cmpf ogt, %8, %9 : vector<128x128xf32>
    %cst_9 = arith.constant 2.000000e-01 : f32
    %11 = vector.broadcast %cst_9 : f32 to vector<128x128xf32>
    %12 = arith.mulf %11, %8 : vector<128x128xf32>
    %13 = arith.select %10, %8, %12 : vector<128x128xi1>, vector<128x128xf32>
    %c0_10 = arith.constant 0 : index
    %c0_11 = arith.constant 0 : index
    %c0_12 = arith.constant 0 : index
    %14 = vector.load %arg5[%c0_10, %c0_11, %c0_12] : memref<2x128x128xf32, #tpu.memory_space<vmem>>, vector<1x128x128xf32>
    %15 = vector.shape_cast %14 : vector<1x128x128xf32> to vector<128x128xf32>
    %cst_13 = arith.constant dense<0.000000e+00> : vector<128x128xf32>
    %16 = tpu.matmul %15, %13, %cst_13 {dimension_numbers = #tpu.dot_dimension_numbers<[1], [0], [0], [1], [0, 0, 1, 1], [], []>} : vector<128x128xf32>, vector<128x128xf32>, vector<128x128xf32> -> vector<128x128xf32>
    %c0_14 = arith.constant 0 : index
    %c0_15 = arith.constant 0 : index
    %c0_16 = arith.constant 0 : index
    %17 = vector.load %arg6[%c0_14, %c0_15, %c0_16] : memref<2x128x1xf32, #tpu.memory_space<vmem>>, vector<1x128x1xf32>
    %18 = vector.shape_cast %17 : vector<1x128x1xf32> to vector<128x1xf32>
    %19 = vector.broadcast %18 : vector<128x1xf32> to vector<128x128xf32>
    %20 = arith.addf %16, %19 : vector<128x128xf32>
    %cst_17 = arith.constant 0.000000e+00 : f32
    %21 = vector.broadcast %cst_17 : f32 to vector<128x128xf32>
    %22 = arith.cmpf ogt, %20, %21 : vector<128x128xf32>
    %cst_18 = arith.constant 2.000000e-01 : f32
    %23 = vector.broadcast %cst_18 : f32 to vector<128x128xf32>
    %24 = arith.mulf %23, %20 : vector<128x128xf32>
    %25 = arith.select %22, %20, %24 : vector<128x128xi1>, vector<128x128xf32>
    %26 = arith.addf %1, %25 : vector<128x128xf32>
    %c1 = arith.constant 1 : index
    %c0_19 = arith.constant 0 : index
    %c0_20 = arith.constant 0 : index
    %27 = vector.load %arg3[%c1, %c0_19, %c0_20] : memref<2x128x128xf32, #tpu.memory_space<vmem>>, vector<1x128x128xf32>
    %28 = vector.shape_cast %27 : vector<1x128x128xf32> to vector<128x128xf32>
    %cst_21 = arith.constant dense<0.000000e+00> : vector<128x128xf32>
    %29 = tpu.matmul %28, %26, %cst_21 {dimension_numbers = #tpu.dot_dimension_numbers<[1], [0], [0], [1], [0, 0, 1, 1], [], []>} : vector<128x128xf32>, vector<128x128xf32>, vector<128x128xf32> -> vector<128x128xf32>
    %c1_22 = arith.constant 1 : index
    %c0_23 = arith.constant 0 : index
    %c0_24 = arith.constant 0 : index
    %30 = vector.load %arg4[%c1_22, %c0_23, %c0_24] : memref<2x128x1xf32, #tpu.memory_space<vmem>>, vector<1x128x1xf32>
    %31 = vector.shape_cast %30 : vector<1x128x1xf32> to vector<128x1xf32>
    %32 = vector.broadcast %31 : vector<128x1xf32> to vector<128x128xf32>
    %33 = arith.addf %29, %32 : vector<128x128xf32>
    %cst_25 = arith.constant 0.000000e+00 : f32
    %34 = vector.broadcast %cst_25 : f32 to vector<128x128xf32>
    %35 = arith.cmpf ogt, %33, %34 : vector<128x128xf32>
    %cst_26 = arith.constant 2.000000e-01 : f32
    %36 = vector.broadcast %cst_26 : f32 to vector<128x128xf32>
    %37 = arith.mulf %36, %33 : vector<128x128xf32>
    %38 = arith.select %35, %33, %37 : vector<128x128xi1>, vector<128x128xf32>
    %c1_27 = arith.constant 1 : index
    %c0_28 = arith.constant 0 : index
    %c0_29 = arith.constant 0 : index
    %39 = vector.load %arg5[%c1_27, %c0_28, %c0_29] : memref<2x128x128xf32, #tpu.memory_space<vmem>>, vector<1x128x128xf32>
    %40 = vector.shape_cast %39 : vector<1x128x128xf32> to vector<128x128xf32>
    %cst_30 = arith.constant dense<0.000000e+00> : vector<128x128xf32>
    %41 = tpu.matmul %40, %38, %cst_30 {dimension_numbers = #tpu.dot_dimension_numbers<[1], [0], [0], [1], [0, 0, 1, 1], [], []>} : vector<128x128xf32>, vector<128x128xf32>, vector<128x128xf32> -> vector<128x128xf32>
    %c1_31 = arith.constant 1 : index
    %c0_32 = arith.constant 0 : index
    %c0_33 = arith.constant 0 : index
    %42 = vector.load %arg6[%c1_31, %c0_32, %c0_33] : memref<2x128x1xf32, #tpu.memory_space<vmem>>, vector<1x128x1xf32>
    %43 = vector.shape_cast %42 : vector<1x128x1xf32> to vector<128x1xf32>
    %44 = vector.broadcast %43 : vector<128x1xf32> to vector<128x128xf32>
    %45 = arith.addf %41, %44 : vector<128x128xf32>
    %cst_34 = arith.constant 0.000000e+00 : f32
    %46 = vector.broadcast %cst_34 : f32 to vector<128x128xf32>
    %47 = arith.cmpf ogt, %45, %46 : vector<128x128xf32>
    %cst_35 = arith.constant 2.000000e-01 : f32
    %48 = vector.broadcast %cst_35 : f32 to vector<128x128xf32>
    %49 = arith.mulf %48, %45 : vector<128x128xf32>
    %50 = arith.select %47, %45, %49 : vector<128x128xi1>, vector<128x128xf32>
    %51 = arith.addf %26, %50 : vector<128x128xf32>
    %c0_36 = arith.constant 0 : index
    %c0_37 = arith.constant 0 : index
    %52 = vector.load %arg7[%c0_36, %c0_37] : memref<128x128xf32, #tpu.memory_space<vmem>>, vector<128x128xf32>
    %cst_38 = arith.constant dense<0.000000e+00> : vector<128x128xf32>
    %53 = tpu.matmul %52, %51, %cst_38 {dimension_numbers = #tpu.dot_dimension_numbers<[1], [0], [0], [1], [0, 0, 1, 1], [], []>} : vector<128x128xf32>, vector<128x128xf32>, vector<128x128xf32> -> vector<128x128xf32>
    %c0_39 = arith.constant 0 : index
    %c0_40 = arith.constant 0 : index
    %54 = vector.load %arg8[%c0_39, %c0_40] : memref<128x1xf32, #tpu.memory_space<vmem>>, vector<128x1xf32>
    %55 = vector.broadcast %54 : vector<128x1xf32> to vector<128x128xf32>
    %56 = arith.addf %53, %55 : vector<128x128xf32>
    %c0_41 = arith.constant 0 : index
    %c0_42 = arith.constant 0 : index
    %c0_43 = arith.constant 0 : index
    %57 = vector.load %arg9[%c0_41, %c0_42, %c0_43] : memref<1x128x128xf32, #tpu.memory_space<vmem>>, vector<1x128x128xf32>
    %58 = vector.shape_cast %57 : vector<1x128x128xf32> to vector<128x128xf32>
    %59 = vector.shape_cast %56 : vector<128x128xf32> to vector<1x128x128xf32>
    tpu.vector_store %arg9[%c0_41, %c0_42, %c0_43], %59 {strides = array<i32>} : memref<1x128x128xf32, #tpu.memory_space<vmem>>, vector<1x128x128xf32>,
    return
  }
  func.func @transform_0(%arg0: i32, %arg1: i32) -> (i32, i32, i32) {
    %c0_i32 = arith.constant 0 : i32
    %c0_i32_0 = arith.constant 0 : i32
    return %arg0, %c0_i32, %arg1 : i32, i32, i32
  }
  func.func @transform_1(%arg0: i32, %arg1: i32) -> (i32, i32, i32) {
    %c0_i32 = arith.constant 0 : i32
    %c0_i32_0 = arith.constant 0 : i32
    %c0_i32_1 = arith.constant 0 : i32
    %c0_i32_2 = arith.constant 0 : i32
    return %c0_i32, %c0_i32_0, %c0_i32_1 : i32, i32, i32
  }
  func.func @transform_2(%arg0: i32, %arg1: i32) -> (i32, i32, i32) {
    %c0_i32 = arith.constant 0 : i32
    %c0_i32_0 = arith.constant 0 : i32
    %c0_i32_1 = arith.constant 0 : i32
    %c0_i32_2 = arith.constant 0 : i32
    return %c0_i32, %c0_i32_0, %c0_i32_1 : i32, i32, i32
  }
  func.func @transform_3(%arg0: i32, %arg1: i32) -> (i32, i32, i32) {
    %c0_i32 = arith.constant 0 : i32
    %c0_i32_0 = arith.constant 0 : i32
    %c0_i32_1 = arith.constant 0 : i32
    %c0_i32_2 = arith.constant 0 : i32
    return %c0_i32, %c0_i32_0, %c0_i32_1 : i32, i32, i32
  }
  func.func @transform_4(%arg0: i32, %arg1: i32) -> (i32, i32, i32) {
    %c0_i32 = arith.constant 0 : i32
    %c0_i32_0 = arith.constant 0 : i32
    %c0_i32_1 = arith.constant 0 : i32
    %c0_i32_2 = arith.constant 0 : i32
    return %c0_i32, %c0_i32_0, %c0_i32_1 : i32, i32, i32
  }
  func.func @transform_5(%arg0: i32, %arg1: i32) -> (i32, i32) {
    %c0_i32 = arith.constant 0 : i32
    %c0_i32_0 = arith.constant 0 : i32
    %c0_i32_1 = arith.constant 0 : i32
    return %c0_i32, %c0_i32_0 : i32, i32
  }
  func.func @transform_6(%arg0: i32, %arg1: i32) -> (i32, i32) {
    %c0_i32 = arith.constant 0 : i32
    %c0_i32_0 = arith.constant 0 : i32
    %c0_i32_1 = arith.constant 0 : i32
    return %c0_i32, %c0_i32_0 : i32, i32
  }
  func.func @transform_7(%arg0: i32, %arg1: i32) -> (i32, i32, i32) {
    %c0_i32 = arith.constant 0 : i32
    %c0_i32_0 = arith.constant 0 : i32
    return %arg0, %c0_i32, %arg1 : i32, i32, i32
  }
}

</mosaic_0001>

<bundles_post_ra>
// kernel: fcblock_forward.1
= control target key start
LH: loop header
LB: loop body
LE: loop exit
PB: predicated region body
PF: predicated region fallthrough
CT: control target
= control target key end

     0   :  { %s1756_s24 = smov 0   ;;  %s1758_s25 = smov 0   ;;  %s2554_s0 = inlined_call_operand.vmem [shape: f32[2,128,128], index: 0, kind: input, shape index: {}]   ;;  %s2555_s1 = inlined_call_operand.vmem [shape: f32[2,128,128], index: 1, kind: input, shape index: {}]   ;;  %s2556_s2 = inlined_call_operand.vmem [shape: f32[2,128,1], index: 2, kind: input, shape index: {}]   ;;  %s2557_s3 = inlined_call_operand.vmem [shape: f32[2,128,128], index: 3, kind: input, shape index: {}]   ;;  %s2558_s4 = inlined_call_operand.vmem [shape: f32[2,128,1], index: 4, kind: input, shape index: {}]   ;;  %s2559_s5 = inlined_call_operand.vmem [shape: f32[128,128], index: 5, kind: input, shape index: {}]   ;;  %s2560_s6 = inlined_call_operand.vmem [shape: f32[128,1], index: 6, kind: input, shape index: {}]   ;;  %s2561_s7 = inlined_call_operand.vmem [shape: f32[2,128,128], index: 7, kind: output, shape index: {}]  }
   0x1   :  { %s1760_s26 = smov 0  }
   0x2 LB: > { %s29_s27 = sadd.s32 1, %s1709_s25  ;;  %p1542_p0 = scmp.ge.s32.totalorder %s1713_s26, 1  ;;  %s1713_s26 = sphi %s1760_s26, %s17_s26   ;;  %s1709_s25 = sphi %s1758_s25, %s2563_s25   ;;  %s1705_s24 = sphi %s1756_s24, %s2562_s24  }
   0x3   : > { %p31_p1 = scmp.ge.s32.totalorder %s29_s27, 2  ;;  %p256_p2 = scmp.lt.s32.totalorder %s1713_s26, 3 }
   0x5   : > { %s2565_s27 = smov (%p31_p1, %s29_s27), 0  ;;  %p257_p3 = pnand %p1542_p0, %p256_p2 }
   0x6   : > { %p294_p4 = scmp.lt.s32.totalorder (!%p257_p3), %s1705_s24, 1 }
   0x7   : > { %260 = sbr.rel (%p257_p3) target bundleno = 1358 (0x54e), region = 48 }
   0xc   : > { %v357_v0 = vld [vmem:[%s2556_s2 + $0x78] sm:$0xff]  ;;  %v355_v1 = vld [vmem:[%s2556_s2 + $0x68] sm:$0xff]  ;;  %v1715_v3 = vmov 0   ;;  %s2567_s24 = smov (!%p294_p4, %s1705_s24), 1  ;;  %v356_v6 = vld [vmem:[%s2556_s2 + $0x70] sm:$0xff] }
   0xd   : > { %v353_v2 = vld [vmem:[%s2556_s2 + $0x58] sm:$0xff]  ;;  %1690 = vset.pattern.permute.xlu2 %v1715_v3  ;;  %1689 = vset.pattern.permute.xlu1 %v1715_v3  ;;  %s1613_s11 = sshll.u32 %s2567_s24, 7  ;;  %v354_v7 = vld [vmem:[%s2556_s2 + $0x60] sm:$0xff]  ;;  %v352_v8 = vld [vmem:[%s2556_s2 + $0x50] sm:$0xff] }
   0xe   : > { %1688 = vset.pattern.permute.xlu0 %v1715_v3  ;;  %425 = vperm.xlu1 %1689, %v355_v1   ;;  %s1791_s14 = scalar_lea.vmem %s2554_s0, %s1613_s11  ;;  %v351_v13 = vld [vmem:[%s2556_s2 + $0x48] sm:$0xff]  ;;  %v350_v14 = vld [vmem:[%s2556_s2 + $0x40] sm:$0xff]  ;;  %v349_v15 = vld [vmem:[%s2556_s2 + $0x38] sm:$0xff] }
   0xf   : > { %435 = vperm.xlu0 %1688, %v357_v0   ;;  %415 = vperm.xlu2 %1690, %v353_v2   ;;  %v1794_v4 = vld [vmem:[%s1791_s14 + $0x78] sm:$0xff]  ;;  %v1797_v5 = vld [vmem:[%s1791_s14 + $0x70] sm:$0xff]  ;;  %v1815_v9 = vld [vmem:[%s1791_s14 + $0x68] sm:$0xff] }
  0x10   : > { %438 = vmatpush.msra.mxu0 %v1794_v4  ;;  %1615 = vmatpush.msra.mxu1 %v1794_v4  ;;  %v1820_v10 = vld [vmem:[%s1791_s14 + $0x60] sm:$0xff]  ;;  %v1826_v11 = vld [vmem:[%s1791_s14 + $0x58] sm:$0xff]  ;;  %v1833_v12 = vld [vmem:[%s1791_s14 + $0x50] sm:$0xff] }
  0x11   : > { %1616 = vmatpush.msra.mxu2 %v1794_v4  ;;  %1617 = vmatpush.msra.mxu3 %v1794_v4  ;;  %v1853_v16 = vld [vmem:[%s1791_s14 + $0x48] sm:$0xff]  ;;  %v1857_v17 = vld [vmem:[%s1791_s14 + $0x40] sm:$0xff]  ;;  %v1864_v18 = vld [vmem:[%s1791_s14 + $0x38] sm:$0xff] }
  0x12   : > { %439 = vmatpush.msra.mxu0 %v1797_v5  ;;  %1618 = vmatpush.msra.mxu1 %v1797_v5  ;;  %v1871_v19 = vld [vmem:[%s1791_s14 + $0x30] sm:$0xff]  ;;  %v347_v21 = vld [vmem:[%s2556_s2 + $0x28] sm:$0xff]  ;;  %v346_v22 = vld [vmem:[%s2556_s2 + $0x20] sm:$0xff] }
  0x13   : > { %1619 = vmatpush.msra.mxu2 %v1797_v5  ;;  %1620 = vmatpush.msra.mxu3 %v1797_v5  ;;  %v348_v20 = vld [vmem:[%s2556_s2 + $0x30] sm:$0xff]  ;;  %v1889_v23 = vld [vmem:[%s1791_s14 + $0x28] sm:$0xff]  ;;  %v1894_v24 = vld [vmem:[%s1791_s14 + $0x20] sm:$0xff] }
  0x14   : > { %440 = vmatpush.msra.mxu0 %v1815_v9  ;;  %1621 = vmatpush.msra.mxu1 %v1815_v9  ;;  %v1900_v25 = vld [vmem:[%s1791_s14 + $0x18] sm:$0xff]  ;;  %v1907_v26 = vld [vmem:[%s1791_s14 + $0x10] sm:$0xff]  ;;  %v343_v29 = vld [vmem:[%s2556_s2 + $0x8] sm:$0xff] }
  0x15   : > { %1622 = vmatpush.msra.mxu2 %v1815_v9  ;;  %1623 = vmatpush.msra.mxu3 %v1815_v9  ;;  %v345_v27 = vld [vmem:[%s2556_s2 + $0x18] sm:$0xff]  ;;  %v344_v28 = vld [vmem:[%s2556_s2 + $0x10] sm:$0xff]  ;;  %v1927_v30 = vld [vmem:[%s1791_s14 + $0x8] sm:$0xff] }
  0x16   : > { %420 = vperm.xlu1 %1689, %v354_v7   ;;  %441 = vmatpush.msra.mxu0 %v1820_v10  ;;  %v1931_v31 = vld [vmem:[%s1791_s14] sm:$0xff]  ;;  %v582_v37 = vld [vmem:[%s2558_s4 + $0x78] sm:$0xff]  ;;  %v581_v38 = vld [vmem:[%s2558_s4 + $0x70] sm:$0xff]  ;;  %s2527_s14 = scalar_lea.vmem %s2561_s7, %s1613_s11 }
  0x17   : > { %430 = vperm.xlu0 %1688, %v356_v6   ;;  %410 = vperm.xlu2 %1690, %v352_v8   ;;  %v326_v32 = vld [vmem:[%s2555_s1] sm:$0xff]  ;;  %v327_v39 = vld [vmem:[%s2555_s1 + $0x8] sm:$0xff]  ;;  %v578_v45 = vld [vmem:[%s2558_s4 + $0x58] sm:$0xff] }
  0x18   : > { %1624 = vmatpush.msra.mxu1 %v1820_v10  ;;  %1625 = vmatpush.msra.mxu2 %v1820_v10  ;;  %v330_v33 = vld [vmem:[%s2555_s1 + $0x20] sm:$0xff]  ;;  %v331_v40 = vld [vmem:[%s2555_s1 + $0x28] sm:$0xff]  ;;  %v328_v46 = vld [vmem:[%s2555_s1 + $0x10] sm:$0xff] }
  0x19   : > { %1626 = vmatpush.msra.mxu3 %v1820_v10  ;;  %442 = vmatpush.msra.mxu0 %v1826_v11  ;;  %v334_v34 = vld [vmem:[%s2555_s1 + $0x40] sm:$0xff]  ;;  %v335_v41 = vld [vmem:[%s2555_s1 + $0x48] sm:$0xff]  ;;  %v332_v47 = vld [vmem:[%s2555_s1 + $0x30] sm:$0xff] }
  0x1a   : > { %1627 = vmatpush.msra.mxu1 %v1826_v11  ;;  %1628 = vmatpush.msra.mxu2 %v1826_v11  ;;  %v338_v35 = vld [vmem:[%s2555_s1 + $0x60] sm:$0xff]  ;;  %v339_v42 = vld [vmem:[%s2555_s1 + $0x68] sm:$0xff]  ;;  %v336_v48 = vld [vmem:[%s2555_s1 + $0x50] sm:$0xff] }
  0x1b   : > { %1629 = vmatpush.msra.mxu3 %v1826_v11  ;;  %443 = vmatpush.msra.mxu0 %v1833_v12  ;;  %v342_v36 = vld [vmem:[%s2556_s2] sm:$0xff]  ;;  %v580_v43 = vld [vmem:[%s2558_s4 + $0x68] sm:$0xff]  ;;  %v340_v49 = vld [vmem:[%s2555_s1 + $0x70] sm:$0xff] }
  0x1c   : > { %1630 = vmatpush.msra.mxu1 %v1833_v12  ;;  %1631 = vmatpush.msra.mxu2 %v1833_v12  ;;  %v579_v44 = vld [vmem:[%s2558_s4 + $0x60] sm:$0xff]  ;;  %v577_v50 = vld [vmem:[%s2558_s4 + $0x50] sm:$0xff]  ;;  %v576_v51 = vld [vmem:[%s2558_s4 + $0x48] sm:$0xff] }
  0x1d   : > { %1632 = vmatpush.msra.mxu3 %v1833_v12  ;;  %444 = vmatpush.msra.mxu0 %v1853_v16  ;;  %v575_v52 = vld [vmem:[%s2558_s4 + $0x40] sm:$0xff]  ;;  %v329_v53 = vld [vmem:[%s2555_s1 + $0x18] sm:$0xff]  ;;  %v573_v58 = vld [vmem:[%s2558_s4 + $0x30] sm:$0xff] }
  0x1e   : > { %400 = vperm.xlu1 %1689, %v350_v14   ;;  %1633 = vmatpush.msra.mxu1 %v1853_v16  ;;  %v333_v54 = vld [vmem:[%s2555_s1 + $0x38] sm:$0xff]  ;;  %v572_v59 = vld [vmem:[%s2558_s4 + $0x28] sm:$0xff]  ;;  %v571_v60 = vld [vmem:[%s2558_s4 + $0x20] sm:$0xff] }
  0x1f   : > { %405 = vperm.xlu0 %1688, %v351_v13   ;;  %395 = vperm.xlu2 %1690, %v349_v15   ;;  %v337_v55 = vld [vmem:[%s2555_s1 + $0x58] sm:$0xff]  ;;  %v569_v62 = vld [vmem:[%s2558_s4 + $0x10] sm:$0xff]  ;;  %v568_v63 = vld [vmem:[%s2558_s4 + $0x8] sm:$0xff] }
  0x20   : > { %1634 = vmatpush.msra.mxu2 %v1853_v16  ;;  %1635 = vmatpush.msra.mxu3 %v1853_v16  ;;  %v341_v56 = vld [vmem:[%s2555_s1 + $0x78] sm:$0xff]  ;;  %v567_v0 = vld [vmem:[%s2558_s4] sm:$0xff]  ;;  %v1577_v2 = vld [vmem:[%s2556_s2 + $0xf0] sm:$0xff] }
  0x21   : > { %445 = vmatpush.msra.mxu0 %v1857_v17  ;;  %1636 = vmatpush.msra.mxu1 %v1857_v17  ;;  %v574_v57 = vld [vmem:[%s2558_s4 + $0x38] sm:$0xff]  ;;  %v1576_v3 = vld [vmem:[%s2556_s2 + $0xe8] sm:$0xff]  ;;  %v1575_v6 = vld [vmem:[%s2556_s2 + $0xe0] sm:$0xff] }
  0x22   : > { %1637 = vmatpush.msra.mxu2 %v1857_v17  ;;  %1638 = vmatpush.msra.mxu3 %v1857_v17  ;;  %v570_v61 = vld [vmem:[%s2558_s4 + $0x18] sm:$0xff]  ;;  %v1573_v8 = vld [vmem:[%s2556_s2 + $0xd0] sm:$0xff]  ;;  %v1572_v13 = vld [vmem:[%s2556_s2 + $0xc8] sm:$0xff] }
  0x23   : > { %446 = vmatpush.msra.mxu0 %v1864_v18  ;;  %1639 = vmatpush.msra.mxu1 %v1864_v18  ;;  %v1578_v1 = vld [vmem:[%s2556_s2 + $0xf8] sm:$0xff]  ;;  %v1571_v14 = vld [vmem:[%s2556_s2 + $0xc0] sm:$0xff] }
  0x24   : > { %1640 = vmatpush.msra.mxu2 %v1864_v18  ;;  %1641 = vmatpush.msra.mxu3 %v1864_v18  ;;  %v1574_v7 = vld [vmem:[%s2556_s2 + $0xd8] sm:$0xff] }
  0x25   : > { %447 = vmatpush.msra.mxu0 %v1871_v19  ;;  %1642 = vmatpush.msra.mxu1 %v1871_v19  ;;  %v1570_v15 = vld [vmem:[%s2556_s2 + $0xb8] sm:$0xff] }
  0x26   : > { %1643 = vmatpush.msra.mxu2 %v1871_v19  ;;  %1644 = vmatpush.msra.mxu3 %v1871_v19 }
  0x27   : > { %390 = vperm.xlu0 %1688, %v348_v20   ;;  %385 = vperm.xlu1 %1689, %v347_v21   ;;  %v1569_v20 = vld [vmem:[%s2556_s2 + $0xb0] sm:$0xff]  ;;  %v1568_v21 = vld [vmem:[%s2556_s2 + $0xa8] sm:$0xff] }
  0x28   : > { %380 = vperm.xlu2 %1690, %v346_v22   ;;  %448 = vmatpush.msra.mxu0 %v1889_v23  ;;  %v1567_v22 = vld [vmem:[%s2556_s2 + $0xa0] sm:$0xff] }
  0x29   : > { %1645 = vmatpush.msra.mxu1 %v1889_v23  ;;  %1646 = vmatpush.msra.mxu2 %v1889_v23 }
  0x2a   : > { %1647 = vmatpush.msra.mxu3 %v1889_v23  ;;  %449 = vmatpush.msra.mxu0 %v1894_v24 }
  0x2b   : > { %1648 = vmatpush.msra.mxu1 %v1894_v24  ;;  %1649 = vmatpush.msra.mxu2 %v1894_v24 }
  0x2c   : > { %1650 = vmatpush.msra.mxu3 %v1894_v24  ;;  %450 = vmatpush.msra.mxu0 %v1900_v25 }
  0x2d   : > { %1651 = vmatpush.msra.mxu1 %v1900_v25  ;;  %1652 = vmatpush.msra.mxu2 %v1900_v25 }
  0x2e   : > { %1653 = vmatpush.msra.mxu3 %v1900_v25  ;;  %451 = vmatpush.msra.mxu0 %v1907_v26 }
  0x2f   : > { %1654 = vmatpush.msra.mxu1 %v1907_v26  ;;  %1655 = vmatpush.msra.mxu2 %v1907_v26 }
  0x30   : > { %1656 = vmatpush.msra.mxu3 %v1907_v26  ;;  %375 = vperm.xlu0 %1688, %v345_v27   ;;  %v1566_v27 = vld [vmem:[%s2556_s2 + $0x98] sm:$0xff] }
  0x31   : > { %370 = vperm.xlu1 %1689, %v344_v28   ;;  %365 = vperm.xlu2 %1690, %v343_v29   ;;  %v1565_v28 = vld [vmem:[%s2556_s2 + $0x90] sm:$0xff]  ;;  %v1564_v29 = vld [vmem:[%s2556_s2 + $0x88] sm:$0xff] }
  0x32   : > { %452 = vmatpush.msra.mxu0 %v1927_v30  ;;  %1657 = vmatpush.msra.mxu1 %v1927_v30 }
  0x33   : > { %1658 = vmatpush.msra.mxu2 %v1927_v30  ;;  %1659 = vmatpush.msra.mxu3 %v1927_v30 }
  0x34   : > { %453 = vmatpush.msra.mxu0 %v1931_v31  ;;  %1660 = vmatpush.msra.mxu1 %v1931_v31 }
  0x35   : > { %1661 = vmatpush.msra.mxu2 %v1931_v31  ;;  %1662 = vmatpush.msra.mxu3 %v1931_v31 }
  0x36   : > { %454 = vmatmul.f32.vlgmr.msra.gmra.mxu0 %v326_v32  ;;  %466 = vmatmul.f32.vlgmr.msra.gmra.mxu1 %v330_v33  ;;  %v1563_v32 = vld [vmem:[%s2556_s2 + $0x80] sm:$0xff]  ;;  %v1610_v33 = vld [vmem:[%s2558_s4 + $0xf8] sm:$0xff] }
  0x37   : > { %478 = vmatmul.f32.vlgmr.msra.gmra.mxu2 %v334_v34  ;;  %490 = vmatmul.f32.vlgmr.msra.gmra.mxu3 %v338_v35  ;;  %v1609_v34 = vld [vmem:[%s2558_s4 + $0xf0] sm:$0xff]  ;;  %v1608_v35 = vld [vmem:[%s2558_s4 + $0xe8] sm:$0xff] }
  0x38   : > { %360 = vperm.xlu0 %1688, %v342_v36   ;;  %v1607_v36 = vld [vmem:[%s2558_s4 + $0xe0] sm:$0xff] }
  0x39   : > { %660 = vperm.xlu1 %1689, %v582_v37   ;;  %655 = vperm.xlu2 %1690, %v581_v38   ;;  %v1606_v37 = vld [vmem:[%s2558_s4 + $0xd8] sm:$0xff]  ;;  %v1605_v38 = vld [vmem:[%s2558_s4 + $0xd0] sm:$0xff] }
  0x3e   : > { %457 = vmatmul.f32.gmra.mxu0 %v327_v39  ;;  %469 = vmatmul.f32.gmra.mxu1 %v331_v40  ;;  %v1604_v39 = vld [vmem:[%s2558_s4 + $0xc8] sm:$0xff]  ;;  %v1603_v40 = vld [vmem:[%s2558_s4 + $0xc0] sm:$0xff] }
  0x3f   : > { %481 = vmatmul.f32.gmra.mxu2 %v335_v41  ;;  %493 = vmatmul.f32.gmra.mxu3 %v339_v42  ;;  %v1602_v41 = vld [vmem:[%s2558_s4 + $0xb8] sm:$0xff]  ;;  %v1601_v42 = vld [vmem:[%s2558_s4 + $0xb0] sm:$0xff] }
  0x40   : > { %650 = vperm.xlu0 %1688, %v580_v43   ;;  %v1600_v43 = vld [vmem:[%s2558_s4 + $0xa8] sm:$0xff] }
  0x41   : > { %645 = vperm.xlu1 %1689, %v579_v44   ;;  %640 = vperm.xlu2 %1690, %v578_v45   ;;  %v1599_v44 = vld [vmem:[%s2558_s4 + $0xa0] sm:$0xff]  ;;  %v1598_v45 = vld [vmem:[%s2558_s4 + $0x98] sm:$0xff] }
  0x46   : > { %460 = vmatmul.f32.gmra.mxu0 %v328_v46  ;;  %472 = vmatmul.f32.gmra.mxu1 %v332_v47  ;;  %v1597_v46 = vld [vmem:[%s2558_s4 + $0x90] sm:$0xff]  ;;  %v1596_v47 = vld [vmem:[%s2558_s4 + $0x88] sm:$0xff] }
  0x47   : > { %484 = vmatmul.f32.gmra.mxu2 %v336_v48  ;;  %496 = vmatmul.f32.gmra.mxu3 %v340_v49  ;;  %v1595_v48 = vld [vmem:[%s2558_s4 + $0x80] sm:$0xff] }
  0x48   : > { %635 = vperm.xlu0 %1688, %v577_v50   ;;  %v1278_v49 = vld [vmem:[%s2560_s6] sm:$0xff]  ;;  %v1279_v50 = vld [vmem:[%s2560_s6 + $0x8] sm:$0xff] }
  0x49   : > { %630 = vperm.xlu1 %1689, %v576_v51   ;;  %625 = vperm.xlu2 %1690, %v575_v52  }
  0x4e   : > { %463 = vmatmul.f32.gmra.mxu0 %v329_v53  ;;  %475 = vmatmul.f32.gmra.mxu1 %v333_v54  ;;  %v1280_v54 = vld [vmem:[%s2560_s6 + $0x10] sm:$0xff] }
  0x4f   : > { %487 = vmatmul.f32.gmra.mxu2 %v337_v55  ;;  %499 = vmatmul.f32.gmra.mxu3 %v341_v56  ;;  %v1281_v56 = vld [vmem:[%s2560_s6 + $0x18] sm:$0xff] }
  0x50   : > { %620 = vperm.xlu0 %1688, %v574_v57   ;;  %v1282_v57 = vld [vmem:[%s2560_s6 + $0x20] sm:$0xff] }
  0x51   : > { %615 = vperm.xlu1 %1689, %v573_v58   ;;  %610 = vperm.xlu2 %1690, %v572_v59  }
  0x58   : > { %605 = vperm.xlu0 %1688, %v571_v60  }
  0x59   : > { %600 = vperm.xlu1 %1689, %v570_v61   ;;  %595 = vperm.xlu2 %1690, %v569_v62  }
  0x60   : > { %590 = vperm.xlu0 %1688, %v568_v63   ;;  %v1283_v63 = vld [vmem:[%s2560_s6 + $0x28] sm:$0xff] }
  0x61   : > { %585 = vperm.xlu1 %1689, %v567_v0   ;;  %903 = vperm.xlu2 %1690, %v1578_v1   ;;  %v1284_v1 = vld [vmem:[%s2560_s6 + $0x30] sm:$0xff] }
  0x68   : > { %898 = vperm.xlu0 %1688, %v1577_v2   ;;  %v1285_v2 = vld [vmem:[%s2560_s6 + $0x38] sm:$0xff] }
  0x69   : > { %893 = vperm.xlu1 %1689, %v1576_v3   ;;  %888 = vperm.xlu2 %1690, %v1575_v6   ;;  %v416_v59 = vpop.permute.xlu2 %415 }
  0x70   : > { %883 = vperm.xlu0 %1688, %v1574_v7  }
  0x71   : > { %878 = vperm.xlu1 %1689, %v1573_v8   ;;  %873 = vperm.xlu2 %1690, %v1572_v13   ;;  %v411_v13 = vpop.permute.xlu2 %410 }
  0x78   : > { %868 = vperm.xlu0 %1688, %v1571_v14   ;;  %v1286_v14 = vld [vmem:[%s2560_s6 + $0x40] sm:$0xff] }
  0x79   : > { %863 = vperm.xlu1 %1689, %v1570_v15   ;;  %858 = vperm.xlu2 %1690, %v1569_v20   ;;  %v1287_v20 = vld [vmem:[%s2560_s6 + $0x48] sm:$0xff] }
  0x80   : > { %853 = vperm.xlu0 %1688, %v1568_v21   ;;  %v426_v58 = vpop.permute.xlu1 %425  ;;  %v1288_v21 = vld [vmem:[%s2560_s6 + $0x50] sm:$0xff] }
  0x81   : > { %848 = vperm.xlu1 %1689, %v1567_v22   ;;  %843 = vperm.xlu2 %1690, %v1566_v27   ;;  %v436_v51 = vpop.permute.xlu0 %435 }
  0x88   : > { %838 = vperm.xlu0 %1688, %v1565_v28   ;;  %v421_v6 = vpop.permute.xlu1 %420 }
  0x89   : > { %833 = vperm.xlu1 %1689, %v1564_v29   ;;  %828 = vperm.xlu2 %1690, %v1563_v32   ;;  %v431_v62 = vpop.permute.xlu0 %430 }
  0x90   : > { %1130 = vperm.xlu0 %1688, %v1610_v33  }
  0x91   : > { %1125 = vperm.xlu1 %1689, %v1609_v34   ;;  %1120 = vperm.xlu2 %1690, %v1608_v35   ;;  %v406_v15 = vpop.permute.xlu0 %405  ;;  %v401_v34 = vpop.permute.xlu1 %400 }
  0x98   : > { %1115 = vperm.xlu0 %1688, %v1607_v36  }
  0x99   : > { %1110 = vperm.xlu1 %1689, %v1606_v37   ;;  %1105 = vperm.xlu2 %1690, %v1605_v38  }
  0xa0   : > { %1100 = vperm.xlu0 %1688, %v1604_v39   ;;  %v1289_v39 = vld [vmem:[%s2560_s6 + $0x58] sm:$0xff] }
  0xa1   : > { %1095 = vperm.xlu1 %1689, %v1603_v40   ;;  %1090 = vperm.xlu2 %1690, %v1602_v41   ;;  %v396_v40 = vpop.permute.xlu2 %395  ;;  %v1290_v41 = vld [vmem:[%s2560_s6 + $0x60] sm:$0xff] }
  0xa8   : > { %1085 = vperm.xlu0 %1688, %v1601_v42   ;;  %v1291_v42 = vld [vmem:[%s2560_s6 + $0x68] sm:$0xff] }
  0xa9   : > { %1080 = vperm.xlu1 %1689, %v1600_v43   ;;  %1075 = vperm.xlu2 %1690, %v1599_v44  }
  0xb0   : > { %1070 = vperm.xlu0 %1688, %v1598_v45  }
  0xb1   : > { %1065 = vperm.xlu1 %1689, %v1597_v46   ;;  %1060 = vperm.xlu2 %1690, %v1596_v47   ;;  %v391_v46 = vpop.permute.xlu0 %390 }
  0xb3   : > { %v2147_v55 = vpop.f32.mrf.mxu1  ;;  %v2158_v0 = vpop.f32.mrf.mxu0 }
  0xb8   : > { %1055 = vperm.xlu0 %1688, %v1595_v48  }
  0xb9   : > { %1296 = vperm.xlu1 %1689, %v1278_v49   ;;  %1301 = vperm.xlu2 %1690, %v1279_v50  }
  0xba   : > { %v2142_v52 = vpop.f32.mrf.mxu2  ;;  %v491_v53 = vpop.f32.mrf.mxu3 }
  0xbb   : > { %v2166_v3 = vpop.f32.mrf.mxu1  ;;  %v2177_v22 = vpop.f32.mrf.mxu0  ;;  %v492_v36 = vadd.f32 %v491_v53, %v421_v6 }
  0xbc   : > { %v381_v6 = vpop.permute.xlu2 %380 }
  0xbd   : > { %v531_v49 = vmul.f32 0.2, %v492_v36  ;;  %vm515_vm3 = vcmp.gt.f32.partialorder %v492_v36, 0.0 }
  0xc0   : > { %1306 = vperm.xlu0 %1688, %v1280_v54  }
  0xc1   : > { %1311 = vperm.xlu1 %1689, %v1281_v56   ;;  %1316 = vperm.xlu2 %1690, %v1282_v57   ;;  %v480_v57 = vadd.f32 %v2142_v52, %v401_v34 }
  0xc2   : > { %v482_v60 = vpop.f32.mrf.mxu2  ;;  %v494_v61 = vpop.f32.mrf.mxu3 }
  0xc3   : > { %v473_v28 = vpop.f32.mrf.mxu1  ;;  %v495_v32 = vadd.f32 %v494_v61, %v426_v58  ;;  %v461_v50 = vpop.f32.mrf.mxu0  ;;  %v547_v58 = vsel %vm515_vm3, %v492_v36, %v531_v49  ;;  %v1292_v61 = vld [vmem:[%s2560_s6 + $0x70] sm:$0xff]  ;;  %vm511_vm7 = vcmp.gt.f32.partialorder %v480_v57, 0.0  ;;  %v551_v49 = vld [vmem:[%s2557_s3] sm:$0xff] }
  0xc4   : > { %v474_v52 = vadd.f32 %v473_v28, %v391_v46 }
  0xc5   : > { %v532_v45 = vmul.f32 0.2, %v495_v32  ;;  %vm516_vm2 = vcmp.gt.f32.partialorder %v495_v32, 0.0 }
  0xc6   : > { %vm509_vm9 = vcmp.gt.f32.partialorder %v474_v52, 0.0 }
  0xc7   : > { %v548_v53 = vsel %vm516_vm2, %v495_v32, %v532_v45  ;;  %v525_v32 = vmul.f32 0.2, %v474_v52 }
  0xc8   : > { %1321 = vperm.xlu0 %1688, %v1283_v63  }
  0xc9   : > { %1326 = vperm.xlu1 %1689, %v1284_v1   ;;  %1331 = vperm.xlu2 %1690, %v1285_v2  }
  0xca   : > { %v485_v7 = vpop.f32.mrf.mxu2  ;;  %v497_v8 = vpop.f32.mrf.mxu3 }
  0xcb   : > { %v498_v27 = vadd.f32 %v497_v8, %v431_v62  ;;  %v486_v47 = vadd.f32 %v485_v7, %v411_v13  ;;  %v476_v56 = vpop.f32.mrf.mxu1  ;;  %v386_v62 = vpop.permute.xlu1 %385  ;;  %v527_v8 = vmul.f32 0.2, %v480_v57 }
  0xcc   : > { %v477_v63 = vadd.f32 %v476_v56, %v396_v40  ;;  %v376_v13 = vpop.permute.xlu0 %375  ;;  %v556_v56 = vld [vmem:[%s2557_s3 + $0x28] sm:$0xff] }
  0xcd   : > { %v533_v38 = vmul.f32 0.2, %v498_v27  ;;  %vm517_vm1 = vcmp.gt.f32.partialorder %v498_v27, 0.0  ;;  %vm513_vm5 = vcmp.gt.f32.partialorder %v486_v47, 0.0 }
  0xce   : > { %vm510_vm8 = vcmp.gt.f32.partialorder %v477_v63, 0.0 }
  0xcf   : > { %v549_v48 = vsel %vm517_vm1, %v498_v27, %v533_v38  ;;  %v468_v27 = vadd.f32 %v2147_v55, %v381_v6  ;;  %v366_v38 = vpop.permute.xlu2 %365  ;;  %v566_v6 = vld [vmem:[%s2557_s3 + $0x78] sm:$0xff] }
  0xd0   : > { %1336 = vperm.xlu0 %1688, %v1286_v14   ;;  %v471_v14 = vadd.f32 %v2166_v3, %v386_v62  ;;  %v561_v62 = vld [vmem:[%s2557_s3 + $0x50] sm:$0xff] }
  0xd1   : > { %1341 = vperm.xlu1 %1689, %v1287_v20   ;;  %1346 = vperm.xlu2 %1690, %v1288_v21   ;;  %v526_v20 = vmul.f32 0.2, %v477_v63  ;;  %v464_v21 = vpop.f32.mrf.mxu0  ;;  %v523_v3 = vmul.f32 0.2, %v468_v27  ;;  %vm507_vm11 = vcmp.gt.f32.partialorder %v468_v27, 0.0 }
  0xd2   : > { %v500_v29 = vpop.f32.mrf.mxu3  ;;  %v488_v35 = vpop.f32.mrf.mxu2  ;;  %v465_v28 = vadd.f32 %v464_v21, %v376_v13  ;;  %v524_v34 = vmul.f32 0.2, %v471_v14  ;;  %vm508_vm10 = vcmp.gt.f32.partialorder %v471_v14, 0.0 }
  0xd3   : > { %v501_v33 = vadd.f32 %v500_v29, %v436_v51  ;;  %v489_v43 = vadd.f32 %v488_v35, %v416_v59  ;;  %v483_v51 = vadd.f32 %v482_v60, %v406_v15  ;;  %v529_v59 = vmul.f32 0.2, %v486_v47  ;;  %v1293_v60 = vld [vmem:[%s2560_s6 + $0x78] sm:$0xff]  ;;  %v371_v35 = vpop.permute.xlu1 %370 }
  0xd4   : > { %v543_v29 = vsel %vm511_vm7, %v480_v57, %v527_v8  ;;  %v462_v36 = vadd.f32 %v461_v50, %v371_v35  ;;  %v540_v40 = vsel %vm508_vm10, %v471_v14, %v524_v34  ;;  %v522_v55 = vmul.f32 0.2, %v465_v28  ;;  %v557_v57 = vld [vmem:[%s2557_s3 + $0x30] sm:$0xff] }
  0xd5   : > { %vm518_vm0 = vcmp.gt.f32.partialorder %v501_v33, 0.0  ;;  %v534_v37 = vmul.f32 0.2, %v501_v33  ;;  %v530_v54 = vmul.f32 0.2, %v489_v43  ;;  %vm514_vm4 = vcmp.gt.f32.partialorder %v489_v43, 0.0 }
  0xd6   : > { %v528_v2 = vmul.f32 0.2, %v483_v51  ;;  %vm512_vm6 = vcmp.gt.f32.partialorder %v483_v51, 0.0  ;;  %v545_v7 = vsel %vm513_vm5, %v486_v47, %v529_v59  ;;  %vm506_vm12 = vcmp.gt.f32.partialorder %v465_v28, 0.0  ;;  %v559_v59 = vld [vmem:[%s2557_s3 + $0x40] sm:$0xff] }
  0xd7   : > { %v550_v44 = vsel %vm518_vm0, %v501_v33, %v534_v37  ;;  %v546_v1 = vsel %vm514_vm4, %v489_v43, %v530_v54  ;;  %v542_v33 = vsel %vm510_vm8, %v477_v63, %v526_v20  ;;  %v541_v37 = vsel %vm509_vm9, %v474_v52, %v525_v32  ;;  %v555_v54 = vld [vmem:[%s2557_s3 + $0x20] sm:$0xff]  ;;  %v656_v35 = vpop.permute.xlu2 %655 }
  0xd8   : > { %663 = vmatpush.msrb.mxu1 %v550_v44  ;;  %1351 = vperm.xlu0 %1688, %v1289_v39   ;;  %v544_v15 = vsel %vm512_vm6, %v483_v51, %v528_v2  ;;  %v459_v39 = vadd.f32 %v2177_v22, %v366_v38  ;;  %v539_v43 = vsel %vm507_vm11, %v468_v27, %v523_v3  ;;  %v521_v44 = vmul.f32 0.2, %v462_v36  ;;  %v553_v51 = vld [vmem:[%s2557_s3 + $0x10] sm:$0xff]  ;;  %v563_v63 = vld [vmem:[%s2557_s3 + $0x60] sm:$0xff] }
  0xd9   : > { %1356 = vperm.xlu1 %1689, %v1290_v41   ;;  %1361 = vperm.xlu2 %1690, %v1291_v42   ;;  %v361_v41 = vpop.permute.xlu0 %360  ;;  %vm505_vm13 = vcmp.gt.f32.partialorder %v462_v36, 0.0  ;;  %v538_v45 = vsel %vm506_vm12, %v465_v28, %v522_v55  ;;  %v565_v2 = vld [vmem:[%s2557_s3 + $0x70] sm:$0xff] }
  0xda   : > { %664 = vmatpush.msrb.mxu1 %v549_v48  ;;  %v456_v42 = vadd.f32 %v2158_v0, %v361_v41  ;;  %v520_v46 = vmul.f32 0.2, %v459_v39  ;;  %vm504_vm14 = vcmp.gt.f32.partialorder %v459_v39, 0.0  ;;  %v537_v47 = vsel %vm505_vm13, %v462_v36, %v521_v44  ;;  %v552_v0 = vld [vmem:[%s2557_s3 + $0x8] sm:$0xff] }
  0xdc   : > { %665 = vmatpush.msrb.mxu1 %v548_v53  ;;  %v519_v48 = vmul.f32 0.2, %v456_v42  ;;  %vm503_vm15 = vcmp.gt.f32.partialorder %v456_v42, 0.0  ;;  %v536_v22 = vsel %vm504_vm14, %v459_v39, %v520_v46  ;;  %v554_v53 = vld [vmem:[%s2557_s3 + $0x18] sm:$0xff] }
  0xde   : > { %666 = vmatpush.msrb.mxu1 %v547_v58  ;;  %v535_v50 = vsel %vm503_vm15, %v456_v42, %v519_v48  ;;  %v558_v58 = vld [vmem:[%s2557_s3 + $0x38] sm:$0xff] }
  0xdf   : > { %v641_v38 = vpop.permute.xlu2 %640 }
  0xe0   : > { %667 = vmatpush.msrb.mxu1 %v546_v1  ;;  %1366 = vperm.xlu0 %1688, %v1292_v61   ;;  %v560_v61 = vld [vmem:[%s2557_s3 + $0x48] sm:$0xff] }
  0xe1   : > { %1371 = vperm.xlu1 %1689, %v1293_v60   ;;  %v562_v60 = vld [vmem:[%s2557_s3 + $0x58] sm:$0xff]  ;;  %v564_v1 = vld [vmem:[%s2557_s3 + $0x68] sm:$0xff]  ;;  %v651_v36 = vpop.permute.xlu0 %650 }
  0xe2   : > { %668 = vmatpush.msrb.mxu1 %v545_v7 }
  0xe4   : > { %669 = vmatpush.msrb.mxu1 %v544_v15 }
  0xe6   : > { %670 = vmatpush.msrb.mxu1 %v543_v29 }
  0xe8   : > { %671 = vmatpush.msrb.mxu1 %v542_v33  ;;  %v661_v33 = vpop.permute.xlu1 %660 }
  0xe9   : > { %v636_v39 = vpop.permute.xlu0 %635 }
  0xea   : > { %672 = vmatpush.msrb.mxu1 %v541_v37 }
  0xec   : > { %673 = vmatpush.msrb.mxu1 %v540_v40 }
  0xee   : > { %674 = vmatpush.msrb.mxu1 %v539_v43  ;;  %v626_v43 = vpop.permute.xlu2 %625 }
  0xf0   : > { %675 = vmatpush.msrb.mxu1 %v538_v45  ;;  %v646_v37 = vpop.permute.xlu1 %645 }
  0xf1   : > { %v621_v48 = vpop.permute.xlu0 %620 }
  0xf2   : > { %676 = vmatpush.msrb.mxu1 %v537_v47 }
  0xf4   : > { %677 = vmatpush.msrb.mxu1 %v536_v22 }
  0xf6   : > { %678 = vmatpush.msrb.mxu1 %v535_v50 }
  0xf7   : > { %679 = vmatmul.f32.vlgmr.msrb.gmra.mxu1 %v551_v49 }
  0xf8   : > { %v631_v55 = vpop.permute.xlu1 %630 }
  0xff   : > { %682 = vmatmul.f32.gmra.mxu1 %v552_v0 }
 0x100   : > { %v616_v0 = vpop.permute.xlu1 %615 }
 0x107   : > { %685 = vmatmul.f32.gmra.mxu1 %v553_v51 }
 0x10f   : > { %688 = vmatmul.f32.gmra.mxu1 %v554_v53 }
 0x117   : > { %691 = vmatmul.f32.gmra.mxu1 %v555_v54 }
 0x11f   : > { %694 = vmatmul.f32.gmra.mxu1 %v556_v56 }
 0x127   : > { %697 = vmatmul.f32.gmra.mxu1 %v557_v57 }
 0x12f   : > { %700 = vmatmul.f32.gmra.mxu1 %v558_v58 }
 0x137   : > { %703 = vmatmul.f32.gmra.mxu1 %v559_v59 }
 0x13f   : > { %706 = vmatmul.f32.gmra.mxu1 %v560_v61 }
 0x147   : > { %709 = vmatmul.f32.gmra.mxu1 %v561_v62 }
 0x14f   : > { %712 = vmatmul.f32.gmra.mxu1 %v562_v60 }
 0x157   : > { %715 = vmatmul.f32.gmra.mxu1 %v563_v63 }
 0x15f   : > { %718 = vmatmul.f32.gmra.mxu1 %v564_v1 }
 0x167   : > { %721 = vmatmul.f32.gmra.mxu1 %v565_v2  ;;  %v611_v2 = vpop.permute.xlu2 %610 }
 0x16f   : > { %724 = vmatmul.f32.gmra.mxu1 %v566_v6 }
 0x174   : > { %v2247_v52 = vpop.f32.mrf.mxu1 }
 0x17c   : > { %v2249_v7 = vpop.f32.mrf.mxu1 }
 0x184   : > { %v2251_v8 = vpop.f32.mrf.mxu1 }
 0x18c   : > { %v2253_v13 = vpop.f32.mrf.mxu1 }
 0x194   : > { %v2255_v14 = vpop.f32.mrf.mxu1 }
 0x19c   : > { %v2257_v15 = vpop.f32.mrf.mxu1 }
 0x1a4   : > { %v698_v20 = vpop.f32.mrf.mxu1 }
 0x1ac   : > { %v701_v21 = vpop.f32.mrf.mxu1 }
 0x1b4   : > { %v704_v27 = vpop.f32.mrf.mxu1 }
 0x1b5   : > { %v705_v60 = vadd.f32 %v704_v27, %v626_v43  ;;  %v699_v27 = vadd.f32 %v698_v20, %v616_v0 }
 0x1b7   : > { %vm736_vm7 = vcmp.gt.f32.partialorder %v705_v60, 0.0  ;;  %vm734_vm9 = vcmp.gt.f32.partialorder %v699_v27, 0.0 }
 0x1bc   : > { %v707_v29 = vpop.f32.mrf.mxu1 }
 0x1bd   : > { %v708_v58 = vadd.f32 %v707_v29, %v631_v55  ;;  %v596_v55 = vpop.permute.xlu2 %595 }
 0x1bf   : > { %v753_v29 = vmul.f32 0.2, %v708_v58  ;;  %vm737_vm6 = vcmp.gt.f32.partialorder %v708_v58, 0.0 }
 0x1c4   : > { %v710_v32 = vpop.f32.mrf.mxu1 }
 0x1c5   : > { %v711_v51 = vadd.f32 %v710_v32, %v636_v39 }
 0x1c7   : > { %v754_v63 = vmul.f32 0.2, %v711_v51  ;;  %vm738_vm5 = vcmp.gt.f32.partialorder %v711_v51, 0.0 }
 0x1cc   : > { %v713_v28 = vpop.f32.mrf.mxu1 }
 0x1cd   : > { %v714_v22 = vadd.f32 %v713_v28, %v641_v38  ;;  %v606_v28 = vpop.permute.xlu0 %605 }
 0x1ce   : > { %v693_v20 = vadd.f32 %v2255_v14, %v606_v28  ;;  %v687_v14 = vadd.f32 %v2251_v8, %v596_v55 }
 0x1cf   : > { %v755_v59 = vmul.f32 0.2, %v714_v22  ;;  %vm739_vm4 = vcmp.gt.f32.partialorder %v714_v22, 0.0 }
 0x1d0   : > { %vm732_vm11 = vcmp.gt.f32.partialorder %v693_v20, 0.0  ;;  %vm730_vm13 = vcmp.gt.f32.partialorder %v687_v14, 0.0 }
 0x1d1   : > { %v771_v32 = vsel %vm739_vm4, %v714_v22, %v755_v59  ;;  %v1554_v59 = vld [vmem:[%s2555_s1 + $0xb8] sm:$0xff] }
 0x1d4   : > { %v716_v34 = vpop.f32.mrf.mxu1 }
 0x1d5   : > { %v717_v45 = vadd.f32 %v716_v34, %v646_v37  ;;  %v770_v34 = vsel %vm738_vm5, %v711_v51, %v754_v63  ;;  %v769_v37 = vsel %vm737_vm6, %v708_v58, %v753_v29  ;;  %v591_v43 = vpop.permute.xlu0 %590  ;;  %v1553_v58 = vld [vmem:[%s2555_s1 + $0xb0] sm:$0xff] }
 0x1d6   : > { %v1557_v63 = vld [vmem:[%s2555_s1 + $0xd0] sm:$0xff] }
 0x1d7   : > { %v756_v53 = vmul.f32 0.2, %v717_v45  ;;  %vm740_vm3 = vcmp.gt.f32.partialorder %v717_v45, 0.0  ;;  %v1561_v29 = vld [vmem:[%s2555_s1 + $0xf0] sm:$0xff] }
 0x1d9   : > { %v772_v1 = vsel %vm740_vm3, %v717_v45, %v756_v53 }
 0x1dc   : > { %v719_v3 = vpop.f32.mrf.mxu1 }
 0x1dd   : > { %v720_v42 = vadd.f32 %v719_v3, %v651_v36  ;;  %v750_v3 = vmul.f32 0.2, %v699_v27  ;;  %v899_v55 = vpop.permute.xlu0 %898 }
 0x1df   : > { %v757_v49 = vmul.f32 0.2, %v720_v42  ;;  %vm741_vm2 = vcmp.gt.f32.partialorder %v720_v42, 0.0 }
 0x1e1   : > { %v773_v61 = vsel %vm741_vm2, %v720_v42, %v757_v49  ;;  %v766_v42 = vsel %vm734_vm9, %v699_v27, %v750_v3 }
 0x1e2   : > { %v2268_v6 = vadd.f32 %v773_v61, %v1815_v9  ;;  %v2276_v9 = vadd.f32 %v771_v32, %v1826_v11  ;;  %v2286_v11 = vadd.f32 %v769_v37, %v1853_v16  ;;  %v1555_v61 = vld [vmem:[%s2555_s1 + $0xc0] sm:$0xff]  ;;  %v1562_v32 = vld [vmem:[%s2555_s1 + $0xf8] sm:$0xff] }
 0x1e4   : > { %v722_v40 = vpop.f32.mrf.mxu1 }
 0x1e5   : > { %v723_v41 = vadd.f32 %v722_v40, %v656_v35  ;;  %v601_v35 = vpop.permute.xlu1 %600 }
 0x1e7   : > { %v758_v46 = vmul.f32 0.2, %v723_v41  ;;  %vm742_vm0 = vcmp.gt.f32.partialorder %v723_v41, 0.0 }
 0x1e9   : > { %v774_v56 = vsel %vm742_vm0, %v723_v41, %v758_v46  ;;  %v748_v41 = vmul.f32 0.2, %v693_v20 }
 0x1ea   : > { %v2264_v62 = vadd.f32 %v774_v56, %v1797_v5  ;;  %v2272_v5 = vadd.f32 %v772_v1, %v1820_v10  ;;  %v2281_v10 = vadd.f32 %v770_v34, %v1833_v12  ;;  %v1552_v56 = vld [vmem:[%s2555_s1 + $0xa8] sm:$0xff]  ;;  %v1558_v1 = vld [vmem:[%s2555_s1 + $0xd8] sm:$0xff] }
 0x1ec   : > { %v725_v44 = vpop.f32.mrf.mxu1 }
 0x1ed   : > { %v726_v47 = vadd.f32 %v725_v44, %v661_v33  ;;  %v752_v33 = vmul.f32 0.2, %v705_v60  ;;  %v586_v46 = vpop.permute.xlu1 %585 }
 0x1ee   : > { %v681_v8 = vadd.f32 %v2247_v52, %v586_v46 }
 0x1ef   : > { %v759_v50 = vmul.f32 0.2, %v726_v47  ;;  %vm743_vm1 = vcmp.gt.f32.partialorder %v726_v47, 0.0  ;;  %v768_v38 = vsel %vm736_vm7, %v705_v60, %v752_v33  ;;  %v1556_v60 = vld [vmem:[%s2555_s1 + $0xc8] sm:$0xff] }
 0x1f0   : > { %v2291_v12 = vadd.f32 %v768_v38, %v1857_v17  ;;  %v2301_v17 = vadd.f32 %v766_v42, %v1871_v19  ;;  %v744_v19 = vmul.f32 0.2, %v681_v8  ;;  %vm728_vm15 = vcmp.gt.f32.partialorder %v681_v8, 0.0 }
 0x1f1   : > { %v775_v54 = vsel %vm743_vm1, %v726_v47, %v759_v50  ;;  %v746_v47 = vmul.f32 0.2, %v687_v14 }
 0x1f2   : > { %v2260_v57 = vadd.f32 %v775_v54, %v1794_v4  ;;  %v702_v4 = vadd.f32 %v701_v21, %v621_v48  ;;  %v696_v21 = vadd.f32 %v2257_v15, %v611_v2  ;;  %v690_v15 = vadd.f32 %v2253_v13, %v601_v35  ;;  %v1551_v54 = vld [vmem:[%s2555_s1 + $0xa0] sm:$0xff] }
 0x1f3   : > { %v684_v13 = vadd.f32 %v2249_v7, %v591_v43  ;;  %v764_v48 = vsel %vm732_vm11, %v693_v20, %v748_v41  ;;  %v762_v50 = vsel %vm730_vm13, %v687_v14, %v746_v47  ;;  %v760_v51 = vsel %vm728_vm15, %v681_v8, %v744_v19  ;;  %v1559_v2 = vld [vmem:[%s2555_s1 + $0xe0] sm:$0xff]  ;;  %v884_v43 = vpop.permute.xlu0 %883 }
 0x1f4   : > { %906 = vmatpush.msrb.mxu2 %v2260_v57  ;;  %v751_v36 = vmul.f32 0.2, %v702_v4  ;;  %vm735_vm8 = vcmp.gt.f32.partialorder %v702_v4, 0.0  ;;  %v749_v39 = vmul.f32 0.2, %v696_v21  ;;  %vm733_vm10 = vcmp.gt.f32.partialorder %v696_v21, 0.0 }
 0x1f5   : > { %v747_v44 = vmul.f32 0.2, %v690_v15  ;;  %vm731_vm12 = vcmp.gt.f32.partialorder %v690_v15, 0.0  ;;  %v745_v7 = vmul.f32 0.2, %v684_v13  ;;  %v2310_v49 = vadd.f32 %v764_v48, %v1894_v24  ;;  %v894_v14 = vpop.permute.xlu1 %893 }
 0x1f6   : > { %907 = vmatpush.msrb.mxu2 %v2264_v62  ;;  %v767_v40 = vsel %vm735_vm8, %v702_v4, %v751_v36  ;;  %v765_v45 = vsel %vm733_vm10, %v696_v21, %v749_v39  ;;  %vm729_vm14 = vcmp.gt.f32.partialorder %v684_v13, 0.0  ;;  %v2326_v53 = vadd.f32 %v760_v51, %v1931_v31  ;;  %v1550_v31 = vld [vmem:[%s2555_s1 + $0x98] sm:$0xff]  ;;  %v1560_v4 = vld [vmem:[%s2555_s1 + $0xe8] sm:$0xff]  ;;  %v904_v39 = vpop.permute.xlu2 %903 }
 0x1f7   : > { %v2296_v16 = vadd.f32 %v767_v40, %v1864_v18  ;;  %v2306_v18 = vadd.f32 %v765_v45, %v1889_v23  ;;  %v763_v22 = vsel %vm731_vm12, %v690_v15, %v747_v44  ;;  %v761_v0 = vsel %vm729_vm14, %v684_v13, %v745_v7 }
 0x1f8   : > { %908 = vmatpush.msrb.mxu2 %v2268_v6  ;;  %v2314_v52 = vadd.f32 %v763_v22, %v1900_v25  ;;  %v2318_v23 = vadd.f32 %v762_v50, %v1907_v26  ;;  %v2322_v24 = vadd.f32 %v761_v0, %v1927_v30  ;;  %v1547_v25 = vld [vmem:[%s2555_s1 + $0x80] sm:$0xff]  ;;  %v1548_v26 = vld [vmem:[%s2555_s1 + $0x88] sm:$0xff]  ;;  %v1549_v30 = vld [vmem:[%s2555_s1 + $0x90] sm:$0xff] }
 0x1fa   : > { %909 = vmatpush.msrb.mxu2 %v2272_v5 }
 0x1fb   : > { %v869_v7 = vpop.permute.xlu0 %868 }
 0x1fc   : > { %910 = vmatpush.msrb.mxu2 %v2276_v9 }
 0x1fd   : > { %v879_v44 = vpop.permute.xlu1 %878 }
 0x1fe   : > { %911 = vmatpush.msrb.mxu2 %v2281_v10  ;;  %v889_v42 = vpop.permute.xlu2 %888 }
 0x200   : > { %912 = vmatpush.msrb.mxu2 %v2286_v11 }
 0x202   : > { %913 = vmatpush.msrb.mxu2 %v2291_v12 }
 0x204   : > { %914 = vmatpush.msrb.mxu2 %v2296_v16 }
 0x205   : > { %v864_v0 = vpop.permute.xlu1 %863 }
 0x206   : > { %915 = vmatpush.msrb.mxu2 %v2301_v17  ;;  %v874_v45 = vpop.permute.xlu2 %873 }
 0x208   : > { %916 = vmatpush.msrb.mxu2 %v2306_v18 }
 0x20a   : > { %917 = vmatpush.msrb.mxu2 %v2310_v49 }
 0x20c   : > { %918 = vmatpush.msrb.mxu2 %v2314_v52 }
 0x20e   : > { %919 = vmatpush.msrb.mxu2 %v2318_v23 }
 0x210   : > { %920 = vmatpush.msrb.mxu2 %v2322_v24 }
 0x212   : > { %921 = vmatpush.msrb.mxu2 %v2326_v53 }
 0x213   : > { %922 = vmatmul.f32.vlgmr.msrb.gmra.mxu2 %v1547_v25 }
 0x21b   : > { %925 = vmatmul.f32.gmra.mxu2 %v1548_v26 }
 0x223   : > { %928 = vmatmul.f32.gmra.mxu2 %v1549_v30  ;;  %v859_v30 = vpop.permute.xlu2 %858 }
 0x22b   : > { %931 = vmatmul.f32.gmra.mxu2 %v1550_v31 }
 0x233   : > { %934 = vmatmul.f32.gmra.mxu2 %v1551_v54 }
 0x23b   : > { %937 = vmatmul.f32.gmra.mxu2 %v1552_v56 }
 0x243   : > { %940 = vmatmul.f32.gmra.mxu2 %v1553_v58 }
 0x24b   : > { %943 = vmatmul.f32.gmra.mxu2 %v1554_v59 }
 0x253   : > { %946 = vmatmul.f32.gmra.mxu2 %v1555_v61 }
 0x25b   : > { %949 = vmatmul.f32.gmra.mxu2 %v1556_v60 }
 0x263   : > { %952 = vmatmul.f32.gmra.mxu2 %v1557_v63 }
 0x26b   : > { %955 = vmatmul.f32.gmra.mxu2 %v1558_v1 }
 0x273   : > { %958 = vmatmul.f32.gmra.mxu2 %v1559_v2  ;;  %v854_v2 = vpop.permute.xlu0 %853 }
 0x27b   : > { %961 = vmatmul.f32.gmra.mxu2 %v1560_v4 }
 0x283   : > { %964 = vmatmul.f32.gmra.mxu2 %v1561_v29 }
 0x28b   : > { %967 = vmatmul.f32.gmra.mxu2 %v1562_v32 }
 0x296   : > { %v2377_v28 = vpop.f32.mrf.mxu2 }
 0x29e   : > { %v2379_v27 = vpop.f32.mrf.mxu2 }
 0x2a6   : > { %v2381_v33 = vpop.f32.mrf.mxu2 }
 0x2ae   : > { %v2383_v34 = vpop.f32.mrf.mxu2 }
 0x2b6   : > { %v2385_v35 = vpop.f32.mrf.mxu2 }
 0x2be   : > { %v938_v21 = vpop.f32.mrf.mxu2 }
 0x2c6   : > { %v941_v36 = vpop.f32.mrf.mxu2 }
 0x2ce   : > { %v944_v37 = vpop.f32.mrf.mxu2 }
 0x2cf   : > { %v945_v4 = vadd.f32 %v944_v37, %v864_v0 }
 0x2d1   : > { %vm978_vm8 = vcmp.gt.f32.partialorder %v945_v4, 0.0 }
 0x2d6   : > { %v947_v20 = vpop.f32.mrf.mxu2 }
 0x2d7   : > { %v948_v60 = vadd.f32 %v947_v20, %v869_v7  ;;  %v994_v20 = vmul.f32 0.2, %v945_v4 }
 0x2d9   : > { %vm979_vm7 = vcmp.gt.f32.partialorder %v948_v60, 0.0 }
 0x2de   : > { %v950_v3 = vpop.f32.mrf.mxu2 }
 0x2df   : > { %v951_v58 = vadd.f32 %v950_v3, %v874_v45  ;;  %v844_v3 = vpop.permute.xlu2 %843 }
 0x2e1   : > { %v996_v32 = vmul.f32 0.2, %v951_v58  ;;  %vm980_vm6 = vcmp.gt.f32.partialorder %v951_v58, 0.0 }
 0x2e6   : > { %v953_v38 = vpop.f32.mrf.mxu2 }
 0x2e7   : > { %v954_v31 = vadd.f32 %v953_v38, %v879_v44  ;;  %v942_v38 = vadd.f32 %v941_v36, %v859_v30  ;;  %v839_v44 = vpop.permute.xlu0 %838  ;;  %v829_v7 = vpop.permute.xlu2 %828  ;;  %v1581_v30 = vld [vmem:[%s2557_s3 + $0x90] sm:$0xff] }
 0x2e8   : > { %v930_v45 = vadd.f32 %v2381_v33, %v839_v44 }
 0x2e9   : > { %v997_v1 = vmul.f32 0.2, %v954_v31  ;;  %vm981_vm5 = vcmp.gt.f32.partialorder %v954_v31, 0.0  ;;  %v993_v37 = vmul.f32 0.2, %v942_v38  ;;  %vm977_vm9 = vcmp.gt.f32.partialorder %v942_v38, 0.0 }
 0x2ea   : > { %vm973_vm13 = vcmp.gt.f32.partialorder %v930_v45, 0.0 }
 0x2ee   : > { %v956_v15 = vpop.f32.mrf.mxu2 }
 0x2ef   : > { %v957_v51 = vadd.f32 %v956_v15, %v884_v43  ;;  %v849_v15 = vpop.permute.xlu1 %848  ;;  %v933_v43 = vadd.f32 %v2383_v34, %v844_v3  ;;  %v924_v34 = vadd.f32 %v2377_v28, %v829_v7  ;;  %v1580_v28 = vld [vmem:[%s2557_s3 + $0x88] sm:$0xff] }
 0x2f1   : > { %v998_v61 = vmul.f32 0.2, %v957_v51  ;;  %vm982_vm4 = vcmp.gt.f32.partialorder %v957_v51, 0.0  ;;  %vm974_vm12 = vcmp.gt.f32.partialorder %v933_v43, 0.0  ;;  %vm971_vm15 = vcmp.gt.f32.partialorder %v924_v34, 0.0 }
 0x2f3   : > { %v1014_v29 = vsel %vm982_vm4, %v957_v51, %v998_v61  ;;  %v987_v51 = vmul.f32 0.2, %v924_v34  ;;  %v1587_v61 = vld [vmem:[%s2557_s3 + $0xc0] sm:$0xff] }
 0x2f6   : > { %v959_v40 = vpop.f32.mrf.mxu2 }
 0x2f7   : > { %v960_v22 = vadd.f32 %v959_v40, %v889_v42  ;;  %v995_v40 = vmul.f32 0.2, %v948_v60 }
 0x2f9   : > { %v999_v56 = vmul.f32 0.2, %v960_v22  ;;  %vm983_vm3 = vcmp.gt.f32.partialorder %v960_v22, 0.0  ;;  %v1011_v42 = vsel %vm979_vm7, %v948_v60, %v995_v40  ;;  %v1588_v60 = vld [vmem:[%s2557_s3 + $0xc8] sm:$0xff] }
 0x2fb   : > { %v1015_v63 = vsel %vm983_vm3, %v960_v22, %v999_v56  ;;  %v1584_v56 = vld [vmem:[%s2557_s3 + $0xa8] sm:$0xff] }
 0x2fe   : > { %v962_v41 = vpop.f32.mrf.mxu2 }
 0x2ff   : > { %v963_v47 = vadd.f32 %v962_v41, %v894_v14  ;;  %v1012_v14 = vsel %vm980_vm6, %v951_v58, %v996_v32  ;;  %v936_v41 = vadd.f32 %v2385_v35, %v849_v15  ;;  %v1585_v58 = vld [vmem:[%s2557_s3 + $0xb0] sm:$0xff]  ;;  %v1594_v32 = vld [vmem:[%s2557_s3 + $0xf8] sm:$0xff] }
 0x301   : > { %v1000_v26 = vmul.f32 0.2, %v963_v47  ;;  %vm984_vm2 = vcmp.gt.f32.partialorder %v963_v47, 0.0  ;;  %vm975_vm11 = vcmp.gt.f32.partialorder %v936_v41, 0.0 }
 0x303   : > { %v1016_v59 = vsel %vm984_vm2, %v963_v47, %v1000_v26  ;;  %v1003_v26 = vsel %vm971_vm15, %v924_v34, %v987_v51 }
 0x306   : > { %v965_v13 = vpop.f32.mrf.mxu2 }
 0x307   : > { %v966_v46 = vadd.f32 %v965_v13, %v899_v55  ;;  %v939_v55 = vadd.f32 %v938_v21, %v854_v2  ;;  %v1010_v13 = vsel %vm978_vm8, %v945_v4, %v994_v20  ;;  %v1009_v21 = vsel %vm977_vm9, %v942_v38, %v993_v37  ;;  %v1591_v2 = vld [vmem:[%s2557_s3 + $0xe0] sm:$0xff]  ;;  %v1592_v4 = vld [vmem:[%s2557_s3 + $0xe8] sm:$0xff] }
 0x309   : > { %v1001_v50 = vmul.f32 0.2, %v966_v46  ;;  %vm985_vm1 = vcmp.gt.f32.partialorder %v966_v46, 0.0  ;;  %v992_v36 = vmul.f32 0.2, %v939_v55  ;;  %vm976_vm10 = vcmp.gt.f32.partialorder %v939_v55, 0.0 }
 0x30b   : > { %v1017_v54 = vsel %vm985_vm1, %v966_v46, %v1001_v50  ;;  %v991_v46 = vmul.f32 0.2, %v936_v41  ;;  %v1008_v47 = vsel %vm976_vm10, %v939_v55, %v992_v36 }
 0x30d   : > { %v1007_v22 = vsel %vm975_vm11, %v936_v41, %v991_v46 }
 0x30e   : > { %v968_v8 = vpop.f32.mrf.mxu2 }
 0x30f   : > { %v969_v48 = vadd.f32 %v968_v8, %v904_v39  ;;  %v1013_v39 = vsel %vm981_vm5, %v954_v31, %v997_v1  ;;  %v834_v8 = vpop.permute.xlu1 %833  ;;  %v1582_v31 = vld [vmem:[%s2557_s3 + $0x98] sm:$0xff] }
 0x310   : > { %v927_v35 = vadd.f32 %v2379_v27, %v834_v8  ;;  %v1590_v1 = vld [vmem:[%s2557_s3 + $0xd8] sm:$0xff] }
 0x311   : > { %vm986_vm0 = vcmp.gt.f32.partialorder %v969_v48, 0.0  ;;  %v1002_v19 = vmul.f32 0.2, %v969_v48 }
 0x312   : > { %v988_v33 = vmul.f32 0.2, %v927_v35  ;;  %vm972_vm14 = vcmp.gt.f32.partialorder %v927_v35, 0.0 }
 0x313   : > { %v1018_v25 = vsel %vm986_vm0, %v969_v48, %v1002_v19  ;;  %v990_v48 = vmul.f32 0.2, %v933_v43  ;;  %v989_v19 = vmul.f32 0.2, %v930_v45 }
 0x314   : > { %1133 = vmatpush.msrb.mxu3 %v1018_v25  ;;  %v1004_v27 = vsel %vm972_vm14, %v927_v35, %v988_v33  ;;  %v1579_v25 = vld [vmem:[%s2557_s3 + $0x80] sm:$0xff] }
 0x315   : > { %v1006_v50 = vsel %vm974_vm12, %v933_v43, %v990_v48  ;;  %v1005_v0 = vsel %vm973_vm13, %v930_v45, %v989_v19  ;;  %v1121_v45 = vpop.permute.xlu2 %1120 }
 0x316   : > { %1134 = vmatpush.msrb.mxu3 %v1017_v54  ;;  %v1583_v54 = vld [vmem:[%s2557_s3 + $0xa0] sm:$0xff] }
 0x317   : > { %v1126_v44 = vpop.permute.xlu1 %1125 }
 0x318   : > { %1135 = vmatpush.msrb.mxu3 %v1016_v59  ;;  %v1586_v59 = vld [vmem:[%s2557_s3 + $0xb8] sm:$0xff] }
 0x31a   : > { %1136 = vmatpush.msrb.mxu3 %v1015_v63  ;;  %v1589_v63 = vld [vmem:[%s2557_s3 + $0xd0] sm:$0xff] }
 0x31c   : > { %1137 = vmatpush.msrb.mxu3 %v1014_v29  ;;  %v1593_v29 = vld [vmem:[%s2557_s3 + $0xf0] sm:$0xff] }
 0x31d   : > { %v1106_v35 = vpop.permute.xlu2 %1105 }
 0x31e   : > { %1138 = vmatpush.msrb.mxu3 %v1013_v39 }
 0x31f   : > { %v1111_v8 = vpop.permute.xlu1 %1110 }
 0x320   : > { %1139 = vmatpush.msrb.mxu3 %v1012_v14 }
 0x322   : > { %1140 = vmatpush.msrb.mxu3 %v1011_v42 }
 0x324   : > { %1141 = vmatpush.msrb.mxu3 %v1010_v13  ;;  %v1131_v13 = vpop.permute.xlu0 %1130 }
 0x325   : > { %v1091_v51 = vpop.permute.xlu2 %1090 }
 0x326   : > { %1142 = vmatpush.msrb.mxu3 %v1009_v21 }
 0x328   : > { %1143 = vmatpush.msrb.mxu3 %v1008_v47 }
 0x32a   : > { %1144 = vmatpush.msrb.mxu3 %v1007_v22  ;;  %v1096_v22 = vpop.permute.xlu1 %1095 }
 0x32c   : > { %1145 = vmatpush.msrb.mxu3 %v1006_v50  ;;  %v1116_v21 = vpop.permute.xlu0 %1115 }
 0x32e   : > { %1146 = vmatpush.msrb.mxu3 %v1005_v0 }
 0x330   : > { %1147 = vmatpush.msrb.mxu3 %v1004_v27 }
 0x332   : > { %1148 = vmatpush.msrb.mxu3 %v1003_v26 }
 0x333   : > { %1149 = vmatmul.f32.vlgmr.msrb.gmra.mxu3 %v1579_v25 }
 0x334   : > { %v1101_v48 = vpop.permute.xlu0 %1100 }
 0x33b   : > { %1152 = vmatmul.f32.gmra.mxu3 %v1580_v28 }
 0x33c   : > { %v1086_v28 = vpop.permute.xlu0 %1085 }
 0x343   : > { %1155 = vmatmul.f32.gmra.mxu3 %v1581_v30 }
 0x34b   : > { %1158 = vmatmul.f32.gmra.mxu3 %v1582_v31 }
 0x353   : > { %1161 = vmatmul.f32.gmra.mxu3 %v1583_v54 }
 0x35b   : > { %1164 = vmatmul.f32.gmra.mxu3 %v1584_v56 }
 0x363   : > { %1167 = vmatmul.f32.gmra.mxu3 %v1585_v58 }
 0x36b   : > { %1170 = vmatmul.f32.gmra.mxu3 %v1586_v59 }
 0x373   : > { %1173 = vmatmul.f32.gmra.mxu3 %v1587_v61 }
 0x37b   : > { %1176 = vmatmul.f32.gmra.mxu3 %v1588_v60 }
 0x383   : > { %1179 = vmatmul.f32.gmra.mxu3 %v1589_v63 }
 0x38b   : > { %1182 = vmatmul.f32.gmra.mxu3 %v1590_v1 }
 0x393   : > { %1185 = vmatmul.f32.gmra.mxu3 %v1591_v2 }
 0x39b   : > { %1188 = vmatmul.f32.gmra.mxu3 %v1592_v4 }
 0x3a3   : > { %1191 = vmatmul.f32.gmra.mxu3 %v1593_v29  ;;  %v1081_v29 = vpop.permute.xlu1 %1080 }
 0x3ab   : > { %1194 = vmatmul.f32.gmra.mxu3 %v1594_v32 }
 0x3b6   : > { %v2440_v15 = vpop.f32.mrf.mxu3 }
 0x3be   : > { %v2442_v38 = vpop.f32.mrf.mxu3 }
 0x3c6   : > { %v2444_v39 = vpop.f32.mrf.mxu3 }
 0x3ce   : > { %v2446_v40 = vpop.f32.mrf.mxu3 }
 0x3d6   : > { %v2448_v3 = vpop.f32.mrf.mxu3 }
 0x3de   : > { %v2450_v55 = vpop.f32.mrf.mxu3 }
 0x3e6   : > { %v1168_v14 = vpop.f32.mrf.mxu3 }
 0x3ee   : > { %v1171_v20 = vpop.f32.mrf.mxu3 }
 0x3f6   : > { %v1174_v41 = vpop.f32.mrf.mxu3 }
 0x3f7   : > { %v1175_v1 = vadd.f32 %v1174_v41, %v1096_v22 }
 0x3f9   : > { %vm1206_vm7 = vcmp.gt.f32.partialorder %v1175_v1, 0.0 }
 0x3fe   : > { %v1177_v42 = vpop.f32.mrf.mxu3 }
 0x3ff   : > { %v1178_v59 = vadd.f32 %v1177_v42, %v1101_v48 }
 0x401   : > { %vm1207_vm6 = vcmp.gt.f32.partialorder %v1178_v59, 0.0 }
 0x406   : > { %v1180_v37 = vpop.f32.mrf.mxu3 }
 0x407   : > { %v1181_v30 = vadd.f32 %v1180_v37, %v1106_v35  ;;  %v1172_v37 = vadd.f32 %v1171_v20, %v1091_v51 }
 0x409   : > { %v1224_v2 = vmul.f32 0.2, %v1181_v30  ;;  %vm1208_vm5 = vcmp.gt.f32.partialorder %v1181_v30, 0.0  ;;  %vm1205_vm8 = vcmp.gt.f32.partialorder %v1172_v37, 0.0 }
 0x40e   : > { %v1183_v43 = vpop.f32.mrf.mxu3 }
 0x40f   : > { %v1184_v27 = vadd.f32 %v1183_v43, %v1111_v8  ;;  %v1223_v43 = vmul.f32 0.2, %v1178_v59 }
 0x411   : > { %v1225_v61 = vmul.f32 0.2, %v1184_v27  ;;  %vm1209_vm4 = vcmp.gt.f32.partialorder %v1184_v27, 0.0 }
 0x416   : > { %v1186_v36 = vpop.f32.mrf.mxu3 }
 0x417   : > { %v1187_v50 = vadd.f32 %v1186_v36, %v1116_v21  ;;  %v1169_v36 = vadd.f32 %v1168_v14, %v1086_v28  ;;  %v1166_v21 = vadd.f32 %v2450_v55, %v1081_v29  ;;  %v1276_v29 = vld [vmem:[%s2559_s5 + $0x70] sm:$0xff] }
 0x419   : > { %v1226_v31 = vmul.f32 0.2, %v1187_v50  ;;  %vm1210_vm3 = vcmp.gt.f32.partialorder %v1187_v50, 0.0  ;;  %vm1204_vm9 = vcmp.gt.f32.partialorder %v1169_v36, 0.0  ;;  %vm1203_vm10 = vcmp.gt.f32.partialorder %v1166_v21, 0.0 }
 0x41b   : > { %v1242_v4 = vsel %vm1210_vm3, %v1187_v50, %v1226_v31 }
 0x41c   : > { %v1258_v42 = vadd.f32 %v1242_v4, %v2272_v5  ;;  %v1220_v5 = vmul.f32 0.2, %v1169_v36  ;;  %v1275_v4 = vld [vmem:[%s2559_s5 + $0x68] sm:$0xff] }
 0x41e   : > { %v1189_v46 = vpop.f32.mrf.mxu3  ;;  %v1236_v22 = vsel %vm1204_vm9, %v1169_v36, %v1220_v5 }
 0x41f   : > { %v1190_v34 = vadd.f32 %v1189_v46, %v1121_v45  ;;  %v1071_v45 = vpop.permute.xlu0 %1070  ;;  %v1239_v46 = vsel %vm1207_vm6, %v1178_v59, %v1223_v43  ;;  %v1269_v59 = vld [vmem:[%s2559_s5 + $0x38] sm:$0xff] }
 0x420   : > { %v1255_v14 = vadd.f32 %v1239_v46, %v2286_v11 }
 0x421   : > { %v1227_v25 = vmul.f32 0.2, %v1190_v34  ;;  %vm1211_vm2 = vcmp.gt.f32.partialorder %v1190_v34, 0.0 }
 0x423   : > { %v1243_v60 = vsel %vm1211_vm2, %v1190_v34, %v1227_v25 }
 0x424   : > { %v1259_v32 = vadd.f32 %v1243_v60, %v2268_v6  ;;  %v1221_v6 = vmul.f32 0.2, %v1172_v37  ;;  %v1271_v60 = vld [vmem:[%s2559_s5 + $0x48] sm:$0xff] }
 0x426   : > { %v1192_v47 = vpop.f32.mrf.mxu3  ;;  %v1237_v48 = vsel %vm1205_vm8, %v1172_v37, %v1221_v6 }
 0x427   : > { %v1193_v7 = vadd.f32 %v1192_v47, %v1126_v44  ;;  %v1222_v44 = vmul.f32 0.2, %v1175_v1  ;;  %v1160_v47 = vadd.f32 %v2446_v40, %v1071_v45 }
 0x429   : > { %v1228_v33 = vmul.f32 0.2, %v1193_v7  ;;  %vm1212_vm0 = vcmp.gt.f32.partialorder %v1193_v7, 0.0  ;;  %v1238_v35 = vsel %vm1206_vm7, %v1175_v1, %v1222_v44  ;;  %v1217_v50 = vmul.f32 0.2, %v1160_v47  ;;  %v1273_v1 = vld [vmem:[%s2559_s5 + $0x58] sm:$0xff] }
 0x42a   : > { %v1254_v55 = vadd.f32 %v1238_v35, %v2291_v12  ;;  %vm1201_vm12 = vcmp.gt.f32.partialorder %v1160_v47, 0.0 }
 0x42b   : > { %v1244_v56 = vsel %vm1212_vm0, %v1193_v7, %v1228_v33  ;;  %v1066_v7 = vpop.permute.xlu1 %1065  ;;  %v1056_v33 = vpop.permute.xlu0 %1055 }
 0x42c   : > { %v1260_v63 = vadd.f32 %v1244_v56, %v2264_v62  ;;  %v1240_v62 = vsel %vm1208_vm5, %v1181_v30, %v1224_v2  ;;  %v1151_v12 = vadd.f32 %v2440_v15, %v1056_v33  ;;  %v1267_v56 = vld [vmem:[%s2559_s5 + $0x28] sm:$0xff]  ;;  %v1274_v2 = vld [vmem:[%s2559_s5 + $0x60] sm:$0xff] }
 0x42d   : > { %v1256_v20 = vadd.f32 %v1240_v62, %v2281_v10  ;;  %v1157_v10 = vadd.f32 %v2444_v39, %v1066_v7 }
 0x42e   : > { %v1195_v19 = vpop.f32.mrf.mxu3  ;;  %vm1198_vm15 = vcmp.gt.f32.partialorder %v1151_v12, 0.0 }
 0x42f   : > { %v1196_v0 = vadd.f32 %v1195_v19, %v1131_v13  ;;  %v1241_v13 = vsel %vm1209_vm4, %v1184_v27, %v1225_v61  ;;  %v1253_v19 = vadd.f32 %v1237_v48, %v2296_v16  ;;  %v1216_v51 = vmul.f32 0.2, %v1157_v10  ;;  %v1270_v61 = vld [vmem:[%s2559_s5 + $0x40] sm:$0xff] }
 0x430   : > { %v1257_v41 = vadd.f32 %v1241_v13, %v2276_v9  ;;  %v1219_v9 = vmul.f32 0.2, %v1166_v21  ;;  %vm1200_vm13 = vcmp.gt.f32.partialorder %v1157_v10, 0.0  ;;  %v1233_v16 = vsel %vm1201_vm12, %v1160_v47, %v1217_v50 }
 0x431   : > { %v1229_v26 = vmul.f32 0.2, %v1196_v0  ;;  %vm1213_vm1 = vcmp.gt.f32.partialorder %v1196_v0, 0.0  ;;  %v1232_v28 = vsel %vm1200_vm13, %v1157_v10, %v1216_v51 }
 0x432   : > { %v1235_v40 = vsel %vm1203_vm10, %v1166_v21, %v1219_v9  ;;  %v1248_v15 = vadd.f32 %v1232_v28, %v2318_v23  ;;  %v1264_v23 = vld [vmem:[%s2559_s5 + $0x10] sm:$0xff] }
 0x433   : > { %v1245_v54 = vsel %vm1213_vm1, %v1196_v0, %v1229_v26  ;;  %v1252_v0 = vadd.f32 %v1236_v22, %v2301_v17  ;;  %v1251_v27 = vadd.f32 %v1235_v40, %v2306_v18  ;;  %v1214_v26 = vmul.f32 0.2, %v1151_v12  ;;  %v1297_v37 = vpop.permute.xlu1 %1296  ;;  %v1307_v44 = vpop.permute.xlu0 %1306 }
 0x434   : > { %v1261_v58 = vadd.f32 %v1245_v54, %v2260_v57  ;;  %v1076_v57 = vpop.permute.xlu2 %1075  ;;  %v1249_v17 = vadd.f32 %v1233_v16, %v2314_v52  ;;  %v1263_v52 = vld [vmem:[%s2559_s5 + $0x8] sm:$0xff] }
 0x435   : > { %v1163_v8 = vadd.f32 %v2448_v3, %v1076_v57  ;;  %v1230_v31 = vsel %vm1198_vm15, %v1151_v12, %v1214_v26 }
 0x436   : > { %1374 = vmatpush.msrb.mxu0 %v1261_v58  ;;  %v1246_v54 = vadd.f32 %v1230_v31, %v2326_v53  ;;  %v1266_v53 = vld [vmem:[%s2559_s5 + $0x20] sm:$0xff]  ;;  %v1268_v58 = vld [vmem:[%s2559_s5 + $0x30] sm:$0xff] }
 0x437   : > { %v1218_v34 = vmul.f32 0.2, %v1163_v8  ;;  %vm1202_vm11 = vcmp.gt.f32.partialorder %v1163_v8, 0.0 }
 0x438   : > { %1375 = vmatpush.msrb.mxu0 %v1260_v63  ;;  %v1272_v63 = vld [vmem:[%s2559_s5 + $0x50] sm:$0xff] }
 0x439   : > { %v1234_v39 = vsel %vm1202_vm11, %v1163_v8, %v1218_v34 }
 0x43a   : > { %1376 = vmatpush.msrb.mxu0 %v1259_v32  ;;  %v1277_v32 = vld [vmem:[%s2559_s5 + $0x78] sm:$0xff] }
 0x43b   : > { %v1322_v5 = vpop.permute.xlu0 %1321 }
 0x43c   : > { %1377 = vmatpush.msrb.mxu0 %v1258_v42  ;;  %v1061_v3 = vpop.permute.xlu2 %1060 }
 0x43d   : > { %v1154_v11 = vadd.f32 %v2442_v38, %v1061_v3  ;;  %v1250_v38 = vadd.f32 %v1234_v39, %v2310_v49  ;;  %v1262_v49 = vld [vmem:[%s2559_s5] sm:$0xff] }
 0x43e   : > { %1378 = vmatpush.msrb.mxu0 %v1257_v41  ;;  %v1312_v41 = vpop.permute.xlu1 %1311 }
 0x43f   : > { %v1215_v25 = vmul.f32 0.2, %v1154_v11  ;;  %vm1199_vm14 = vcmp.gt.f32.partialorder %v1154_v11, 0.0 }
 0x440   : > { %1379 = vmatpush.msrb.mxu0 %v1256_v20 }
 0x441   : > { %v1231_v30 = vsel %vm1199_vm14, %v1154_v11, %v1215_v25 }
 0x442   : > { %1380 = vmatpush.msrb.mxu0 %v1255_v14  ;;  %v1247_v18 = vadd.f32 %v1231_v30, %v2322_v24  ;;  %v1265_v24 = vld [vmem:[%s2559_s5 + $0x18] sm:$0xff] }
 0x443   : > { %v1337_v34 = vpop.permute.xlu0 %1336 }
 0x444   : > { %1381 = vmatpush.msrb.mxu0 %v1254_v55  ;;  %v1302_v57 = vpop.permute.xlu2 %1301 }
 0x446   : > { %1382 = vmatpush.msrb.mxu0 %v1253_v19  ;;  %v1327_v47 = vpop.permute.xlu1 %1326 }
 0x448   : > { %1383 = vmatpush.msrb.mxu0 %v1252_v0 }
 0x44a   : > { %1384 = vmatpush.msrb.mxu0 %v1251_v27 }
 0x44b   : > { %v1352_v12 = vpop.permute.xlu0 %1351 }
 0x44c   : > { %1385 = vmatpush.msrb.mxu0 %v1250_v38  ;;  %v1317_v46 = vpop.permute.xlu2 %1316 }
 0x44e   : > { %1386 = vmatpush.msrb.mxu0 %v1249_v17  ;;  %v1342_v19 = vpop.permute.xlu1 %1341 }
 0x450   : > { %1387 = vmatpush.msrb.mxu0 %v1248_v15 }
 0x452   : > { %1388 = vmatpush.msrb.mxu0 %v1247_v18 }
 0x453   : > { %v1367_v17 = vpop.permute.xlu0 %1366 }
 0x454   : > { %1389 = vmatpush.msrb.mxu0 %v1246_v54  ;;  %v1332_v7 = vpop.permute.xlu2 %1331 }
 0x455   : > { %1390 = vmatmul.f32.vlgmr.msrb.gmra.mxu0 %v1262_v49 }
 0x456   : > { %v1357_v27 = vpop.permute.xlu1 %1356 }
 0x45c   : > { %v1347_v40 = vpop.permute.xlu2 %1346 }
 0x45d   : > { %1393 = vmatmul.f32.gmra.mxu0 %v1263_v52 }
 0x45e   : > { %v1372_v31 = vpop.permute.xlu1 %1371 }
 0x464   : > { %v1362_v38 = vpop.permute.xlu2 %1361 }
 0x465   : > { %1396 = vmatmul.f32.gmra.mxu0 %v1264_v23 }
 0x46d   : > { %1399 = vmatmul.f32.gmra.mxu0 %v1265_v24 }
 0x475   : > { %1402 = vmatmul.f32.gmra.mxu0 %v1266_v53 }
 0x47d   : > { %1405 = vmatmul.f32.gmra.mxu0 %v1267_v56 }
 0x485   : > { %1408 = vmatmul.f32.gmra.mxu0 %v1268_v58 }
 0x48d   : > { %1411 = vmatmul.f32.gmra.mxu0 %v1269_v59 }
 0x495   : > { %1414 = vmatmul.f32.gmra.mxu0 %v1270_v61 }
 0x49d   : > { %1417 = vmatmul.f32.gmra.mxu0 %v1271_v60 }
 0x4a5   : > { %1420 = vmatmul.f32.gmra.mxu0 %v1272_v63 }
 0x4ad   : > { %1423 = vmatmul.f32.gmra.mxu0 %v1273_v1 }
 0x4b5   : > { %1426 = vmatmul.f32.gmra.mxu0 %v1274_v2 }
 0x4bd   : > { %1429 = vmatmul.f32.gmra.mxu0 %v1275_v4 }
 0x4c5   : > { %1432 = vmatmul.f32.gmra.mxu0 %v1276_v29 }
 0x4cd   : > { %1435 = vmatmul.f32.gmra.mxu0 %v1277_v32 }
 0x4d2   : > { %v1391_v43 = vpop.f32.mrf.mxu0 }
 0x4d3   : > { %v1392_v13 = vadd.f32 %v1391_v43, %v1297_v37 }
 0x4d5   : > { %1439 = vst [vmem:[%s2527_s14] sm:$0xff] %v1392_v13 }
 0x4da   : > { %v1394_v42 = vpop.f32.mrf.mxu0 }
 0x4db   : > { %v1395_v36 = vadd.f32 %v1394_v42, %v1302_v57 }
 0x4dd   : > { %1440 = vst [vmem:[%s2527_s14 + $0x8] sm:$0xff] %v1395_v36 }
 0x4e2   : > { %v1397_v62 = vpop.f32.mrf.mxu0 }
 0x4e3   : > { %v1398_v45 = vadd.f32 %v1397_v62, %v1307_v44 }
 0x4e5   : > { %1441 = vst [vmem:[%s2527_s14 + $0x10] sm:$0xff] %v1398_v45 }
 0x4ea   : > { %v1400_v21 = vpop.f32.mrf.mxu0 }
 0x4eb   : > { %v1401_v6 = vadd.f32 %v1400_v21, %v1312_v41 }
 0x4ed   : > { %1442 = vst [vmem:[%s2527_s14 + $0x18] sm:$0xff] %v1401_v6 }
 0x4f2   : > { %v1403_v20 = vpop.f32.mrf.mxu0 }
 0x4f3   : > { %v1404_v8 = vadd.f32 %v1403_v20, %v1317_v46 }
 0x4f5   : > { %1443 = vst [vmem:[%s2527_s14 + $0x20] sm:$0xff] %v1404_v8 }
 0x4fa   : > { %v1406_v35 = vpop.f32.mrf.mxu0 }
 0x4fb   : > { %v1407_v14 = vadd.f32 %v1406_v35, %v1322_v5 }
 0x4fd   : > { %1444 = vst [vmem:[%s2527_s14 + $0x28] sm:$0xff] %v1407_v14 }
 0x502   : > { %v1409_v9 = vpop.f32.mrf.mxu0 }
 0x503   : > { %v1410_v48 = vadd.f32 %v1409_v9, %v1327_v47 }
 0x505   : > { %1445 = vst [vmem:[%s2527_s14 + $0x30] sm:$0xff] %v1410_v48 }
 0x50a   : > { %v1412_v55 = vpop.f32.mrf.mxu0 }
 0x50b   : > { %v1413_v10 = vadd.f32 %v1412_v55, %v1332_v7 }
 0x50d   : > { %1446 = vst [vmem:[%s2527_s14 + $0x38] sm:$0xff] %v1413_v10 }
 0x512   : > { %v1415_v22 = vpop.f32.mrf.mxu0 }
 0x513   : > { %v1416_v3 = vadd.f32 %v1415_v22, %v1337_v34 }
 0x515   : > { %1447 = vst [vmem:[%s2527_s14 + $0x40] sm:$0xff] %v1416_v3 }
 0x51a   : > { %v1418_v11 = vpop.f32.mrf.mxu0 }
 0x51b   : > { %v1419_v50 = vadd.f32 %v1418_v11, %v1342_v19 }
 0x51d   : > { %1448 = vst [vmem:[%s2527_s14 + $0x48] sm:$0xff] %v1419_v50 }
 0x522   : > { %v1421_v33 = vpop.f32.mrf.mxu0 }
 0x523   : > { %v1422_v0 = vadd.f32 %v1421_v33, %v1347_v40 }
 0x525   : > { %1449 = vst [vmem:[%s2527_s14 + $0x50] sm:$0xff] %v1422_v0 }
 0x52a   : > { %v1424_v51 = vpop.f32.mrf.mxu0 }
 0x52b   : > { %v1425_v39 = vadd.f32 %v1424_v51, %v1352_v12 }
 0x52d   : > { %1450 = vst [vmem:[%s2527_s14 + $0x58] sm:$0xff] %v1425_v39 }
 0x532   : > { %v1427_v25 = vpop.f32.mrf.mxu0 }
 0x533   : > { %v1428_v16 = vadd.f32 %v1427_v25, %v1357_v27 }
 0x535   : > { %1451 = vst [vmem:[%s2527_s14 + $0x60] sm:$0xff] %v1428_v16 }
 0x53a   : > { %v1430_v26 = vpop.f32.mrf.mxu0 }
 0x53b   : > { %v1431_v28 = vadd.f32 %v1430_v26, %v1362_v38 }
 0x53d   : > { %1452 = vst [vmem:[%s2527_s14 + $0x68] sm:$0xff] %v1431_v28 }
 0x542   : > { %v1433_v30 = vpop.f32.mrf.mxu0 }
 0x543   : > { %v1434_v15 = vadd.f32 %v1433_v30, %v1367_v17 }
 0x545   : > { %1453 = vst [vmem:[%s2527_s14 + $0x70] sm:$0xff] %v1434_v15 }
 0x54a   : > { %v1436_v18 = vpop.f32.mrf.mxu0 }
 0x54b   : > { %v1437_v54 = vadd.f32 %v1436_v18, %v1372_v31 }
 0x54d   : > { %1454 = vst [vmem:[%s2527_s14 + $0x78] sm:$0xff] %v1437_v54 }
 0x54e PF: > { %s17_s26 = sadd.s32 1, %s1713_s26   ;;  %s2562_s24 = smov %s1709_s25 }
 0x54f   : > { %p14_p5 = scmp.ge.s32.totalorder %s17_s26, 4   ;;  %s2563_s25 = smov %s2565_s27 }
 0x551   :  { %16 = sbr.rel (!%p14_p5) target bundleno = 2 (0x2), region = 82 }

</bundles_post_ra>
